<compile_context>
chip_gen: v7x
topology: tpu7x:2x2x1
jax: 0.10.0
libtpu: 0.0.40
codegen_flags: <defaults>
</compile_context>

<pallas_src>
import functools

import jax
import jax.numpy as jnp
import numpy as np
from jax.experimental import pallas as pl
from jax.experimental.pallas import tpu as pltpu


# ----------------------------------------------------------------------------
# Kernel 1: fused  relu(Xc @ W1 + b1) @ W2 + b2 -> relu   (bf16 out)
#   Xc : (tm, K1p)   W1 : (K1p, C)   W2 : (C, C)   b1, b2 : (1, C)
# ActNorm scales are pre-folded into W1/b1 and W2/b2 by the wrapper.
# ----------------------------------------------------------------------------
def _conv12_kernel(xc_ref, w1_ref, b1_ref, w2_ref, b2_ref, o_ref):
    h1 = jnp.dot(xc_ref[...], w1_ref[...], preferred_element_type=jnp.float32)
    h1 = jnp.maximum(h1 + b1_ref[...], 0.0)
    h2 = jnp.dot(h1.astype(jnp.bfloat16), w2_ref[...],
                 preferred_element_type=jnp.float32)
    h2 = jnp.maximum(h2 + b2_ref[...], 0.0)
    o_ref[...] = h2.astype(o_ref.dtype)


def conv12_fused(x_cols, w1, b1, w2, b2, *, tm=None):
    M, K1p = x_cols.shape
    C = w2.shape[1]
    if tm is None:
        # Big tiles for long MXU runs, but keep >=2 grid steps at small M so
        # v7x's second TensorCore is not left idle.
        tm = 512 if M >= 2048 else 256
    nm = -(-M // tm)
    mp = nm * tm
    if mp != M:
        x_cols = jnp.pad(x_cols, ((0, mp - M), (0, 0)))
    out = pl.pallas_call(
        _conv12_kernel,
        out_shape=jax.ShapeDtypeStruct((mp, C), jnp.bfloat16),
        grid_spec=pltpu.PrefetchScalarGridSpec(
            num_scalar_prefetch=0,
            grid=(nm,),
            in_specs=[
                pl.BlockSpec((tm, K1p), lambda i: (i, 0)),
                pl.BlockSpec((K1p, C), lambda i: (0, 0)),
                pl.BlockSpec((1, C), lambda i: (0, 0)),
                pl.BlockSpec((C, C), lambda i: (0, 0)),
                pl.BlockSpec((1, C), lambda i: (0, 0)),
            ],
            out_specs=pl.BlockSpec((tm, C), lambda i: (i, 0)),
        ),
        compiler_params=pltpu.CompilerParams(
            dimension_semantics=("parallel",)),
    )(x_cols, w1.astype(jnp.bfloat16),
      b1.reshape(1, C).astype(jnp.float32), w2.astype(jnp.bfloat16),
      b2.reshape(1, C).astype(jnp.float32))
    return out[:M]


# ----------------------------------------------------------------------------
# Kernel 2a (small Cout, 9*Cout <= 128): tap-packed conv3.
# One GEMM over all padded pixels against a (C, 128) weight whose lane group
# [t*Cout, (t+1)*Cout) holds tap t = kh*3+kw. The 9 tap contributions are then
# combined with spatially shifted slices (kw outer: 3 unaligned W-slices, the
# kh slices are leading-axis and cheap). exp(3*logs) and conv bias are folded
# into w_ref / b_ref by the wrapper.
# ----------------------------------------------------------------------------
def _conv3_packed_kernel(x_ref, w_ref, b_ref, o_ref, *, H, W, Hp, Wp, cout):
    lanes = w_ref.shape[-1]
    y = jnp.dot(x_ref[0], w_ref[...], preferred_element_type=jnp.float32)
    # Layout-preserving reshape: Wp is a multiple of 8.
    y = y.reshape(Hp, Wp, lanes)
    acc = None
    for kw in range(3):
        ycol = y[:, kw:kw + W, :]                  # (Hp, W, lanes)
        for kh in range(3):
            t = kh * 3 + kw
            part = ycol[kh:kh + H, :, t * cout:(t + 1) * cout]
            acc = part if acc is None else acc + part
    o_ref[0] = acc + b_ref[...]


def conv3_packed(h2_nhwc, w3p, b3p, cout):
    # h2_nhwc: (N,H,W,C) bf16 ; w3p: (C, 128) tap-packed ; b3p: (Cout,)
    N, H, W, C = h2_nhwc.shape
    lanes = w3p.shape[-1]
    Hp = H + 2
    Wp = -(-(W + 2) // 8) * 8          # right-pad so flattening is layout-free
    h2p = jnp.pad(h2_nhwc, ((0, 0), (1, 1), (1, Wp - W - 1), (0, 0)))
    h2p = h2p.reshape(N, Hp * Wp, C)   # contiguous merge, free in XLA
    kernel = functools.partial(_conv3_packed_kernel, H=H, W=W, Hp=Hp, Wp=Wp,
                               cout=cout)
    return pl.pallas_call(
        kernel,
        out_shape=jax.ShapeDtypeStruct((N, H, W, cout), jnp.float32),
        grid_spec=pltpu.PrefetchScalarGridSpec(
            num_scalar_prefetch=0,
            grid=(N,),
            in_specs=[
                pl.BlockSpec((1, Hp * Wp, C), lambda n: (n, 0, 0)),
                pl.BlockSpec((C, lanes), lambda n: (0, 0)),
                pl.BlockSpec((1, cout), lambda n: (0, 0)),
            ],
            out_specs=pl.BlockSpec((1, H, W, cout), lambda n: (n, 0, 0, 0)),
        ),
        compiler_params=pltpu.CompilerParams(
            dimension_semantics=("parallel",)),
    )(h2p, w3p.astype(jnp.bfloat16), b3p.reshape(1, cout).astype(jnp.float32))


# ----------------------------------------------------------------------------
# Kernel 2b (wide Cout fallback): original 9-GEMM scheme with lane-dense Np
# output; the 3x3 gather slices the input ref directly (no full-block load).
# ----------------------------------------------------------------------------
def _conv3_wide_kernel(x_ref, w_ref, b_ref, o_ref, *, H, W):
    C = x_ref.shape[-1]
    Np = o_ref.shape[-1]
    acc = jnp.zeros((H * W, Np), jnp.float32)
    for kw in range(3):
        for kh in range(3):
            patch = x_ref[0, kh:kh + H, kw:kw + W, :].reshape(H * W, C)
            acc = acc + jnp.dot(patch, w_ref[kh * 3 + kw],
                                preferred_element_type=jnp.float32)
    o_ref[0] = (acc + b_ref[...]).astype(o_ref.dtype)


def conv3_wide(h2_nhwc, w3, b3):
    # h2_nhwc: (N,H,W,C) bf16 ; w3: (9, C, Np) ; b3: (Np,)
    N, H, W, C = h2_nhwc.shape
    Np = w3.shape[-1]
    h2p = jnp.pad(h2_nhwc, ((0, 0), (1, 1), (1, 1), (0, 0)))
    kernel = functools.partial(_conv3_wide_kernel, H=H, W=W)
    out = pl.pallas_call(
        kernel,
        out_shape=jax.ShapeDtypeStruct((N, H * W, Np), jnp.bfloat16),
        grid_spec=pltpu.PrefetchScalarGridSpec(
            num_scalar_prefetch=0,
            grid=(N,),
            in_specs=[
                pl.BlockSpec((1, H + 2, W + 2, C), lambda n: (n, 0, 0, 0)),
                pl.BlockSpec((9, C, Np), lambda n: (0, 0, 0)),
                pl.BlockSpec((1, Np), lambda n: (0, 0)),
            ],
            out_specs=pl.BlockSpec((1, H * W, Np), lambda n: (n, 0, 0)),
        ),
        compiler_params=pltpu.CompilerParams(
            dimension_semantics=("parallel",)),
    )(h2p, w3.astype(jnp.bfloat16), b3.reshape(1, Np).astype(jnp.float32))
    return out.reshape(N, H, W, Np)


# ----------------------------------------------------------------------------
# im2col for the (cheap, Cin small) conv1 — (kh, kw, ci) K ordering, built
# directly in bf16 and zero-padded to K1p columns.
# ----------------------------------------------------------------------------
def im2col_3x3(x_nhwc, k1p):
    N, H, W, C = x_nhwc.shape
    xp = jnp.pad(x_nhwc.astype(jnp.bfloat16), ((0, 0), (1, 1), (1, 1), (0, 0)))
    cols = [xp[:, kh:kh + H, kw:kw + W, :]
            for kh in range(3) for kw in range(3)]
    patches = jnp.stack(cols, axis=3)              # (N,H,W,9,C), tap-major
    x_cols = patches.reshape(N * H * W, 9 * C)     # K ordering = (kh, kw, ci)
    if k1p > 9 * C:
        x_cols = jnp.pad(x_cols, ((0, 0), (0, k1p - 9 * C)))
    return x_cols


# ----------------------------------------------------------------------------
# Full forward pass (NHWC activations).
# ActNorm forward (non-reverse): y = (x + an_bias) * exp(an_logs); since
# exp(.) > 0 the shift/scale commute with ReLU and are folded into the GEMM
# weights/biases below.
# ----------------------------------------------------------------------------
def nn_forward(x_nhwc, params, *, tm=None):
    N, H, W, Cin = x_nhwc.shape
    Cout = params["w3"].shape[0]
    Cmid = params["w1"].shape[0]                    # 512

    s1 = jnp.exp(params["an1_logs"])
    s2 = jnp.exp(params["an2_logs"])
    s3 = jnp.exp(3.0 * params["logs"])

    # Fold per-channel scales into weights / biases:  (XW + b)*s = X(Ws) + bs
    K1 = 9 * Cin
    K1p = -(-K1 // 64) * 64                         # bf16-friendly K padding
    w1 = (jnp.transpose(params["w1"], (2, 3, 1, 0)).reshape(K1, Cmid)
          * s1[None, :])
    w1 = jnp.pad(w1, ((0, K1p - K1), (0, 0)))
    b1 = (params["b1"] + params["an1_bias"]) * s1
    w2 = params["w2"].reshape(Cmid, Cmid).T * s2[None, :]
    b2 = (params["b2"] + params["an2_bias"]) * s2

    # conv1 -> actnorm1 -> relu -> conv2 -> actnorm2 -> relu (single kernel)
    x_cols = im2col_3x3(x_nhwc, K1p)                            # (M, K1p) bf16
    h2 = conv12_fused(x_cols, w1, b1, w2, b2, tm=tm)            # (M, Cmid) bf16
    h2 = h2.reshape(N, H, W, Cmid)

    # conv3 -> * exp(3*logs)
    if 9 * Cout <= 128:
        # Tap-packed single-GEMM path (lanes = 128).
        w3p = (jnp.transpose(params["w3"], (1, 2, 3, 0)) * s3).reshape(
            Cmid, 9 * Cout)
        w3p = jnp.pad(w3p, ((0, 0), (0, 128 - 9 * Cout)))
        b3p = params["b3"] * s3
        out = conv3_packed(h2, w3p, b3p, Cout)                  # (N,H,W,Cout) f32
    else:
        Np = -(-Cout // 128) * 128
        w3 = (jnp.transpose(params["w3"], (2, 3, 1, 0)).reshape(9, Cmid, Cout)
              * s3[None, None, :])
        w3 = jnp.pad(w3, ((0, 0), (0, 0), (0, Np - Cout)))
        b3 = jnp.pad(params["b3"] * s3, (0, Np - Cout))
        out = conv3_wide(h2, w3, b3)[..., :Cout].astype(jnp.float32)
    return out


# ----------------------------------------------------------------------------
# Deterministic parameter construction (mirrors the PyTorch __init__).
# ----------------------------------------------------------------------------
def make_params(key, channels_in, channels_out):
    ks = jax.random.split(key, 7)
    return {
        "w1": 0.01 * jax.random.normal(ks[0], (512, channels_in, 3, 3), jnp.float32),
        "b1": jnp.zeros((512,), jnp.float32),
        "w2": 0.01 * jax.random.normal(ks[1], (512, 512, 1, 1), jnp.float32),
        "b2": jnp.zeros((512,), jnp.float32),
        "w3": 0.01 * jax.random.normal(ks[2], (channels_out, 512, 3, 3), jnp.float32),
        "b3": jnp.zeros((channels_out,), jnp.float32),
        # ActNorm / logs params (nonzero to exercise the folded scale paths)
        "an1_bias": 0.1 * jax.random.normal(ks[3], (512,), jnp.float32),
        "an1_logs": 0.05 * jax.random.normal(ks[4], (512,), jnp.float32),
        "an2_bias": jnp.zeros((512,), jnp.float32),
        "an2_logs": 0.05 * jax.random.normal(ks[5], (512,), jnp.float32),
        "logs": 0.05 * jax.random.normal(ks[6], (channels_out,), jnp.float32),
    }


# ----------------------------------------------------------------------------
# Pure-JAX reference (f32 lax conv, NCHW like PyTorch) for correctness check.
# ----------------------------------------------------------------------------
def reference_forward(x_nchw, params):
    def conv(x, w, b, pad):
        y = jax.lax.conv_general_dilated(
            x, w, window_strides=(1, 1), padding=[(pad, pad), (pad, pad)],
            dimension_numbers=("NCHW", "OIHW", "NCHW"))
        return y + b[None, :, None, None]

    x = conv(x_nchw, params["w1"], params["b1"], 1)
    x = (x + params["an1_bias"][None, :, None, None]) * jnp.exp(
        params["an1_logs"])[None, :, None, None]
    x = jnp.maximum(x, 0.0)
    x = conv(x, params["w2"], params["b2"], 0)
    x = (x + params["an2_bias"][None, :, None, None]) * jnp.exp(
        params["an2_logs"])[None, :, None, None]
    x = jnp.maximum(x, 0.0)
    x = conv(x, params["w3"], params["b3"], 1)
    x = x * jnp.exp(3.0 * params["logs"])[None, :, None, None]
    return x


if __name__ == "__main__":
    key = jax.random.PRNGKey(0)
    kx, kp = jax.random.split(key)

    batch, channels_in, channels_out, H, W = 2, 4, 4, 16, 16
    x_nchw = jax.random.normal(kx, (batch, channels_in, H, W), jnp.float32)
    params = make_params(kp, channels_in, channels_out)

    # Pallas path works in NHWC; convert the NCHW input.
    x_nhwc = jnp.transpose(x_nchw, (0, 2, 3, 1))
    out_nhwc = nn_forward(x_nhwc, params)
    out_nchw = jnp.transpose(out_nhwc, (0, 3, 1, 2))
    out_nchw = jax.block_until_ready(out_nchw)

    ref = jax.block_until_ready(reference_forward(x_nchw, params))
    # bf16 MXU inputs / bf16 intermediate activations (f32 accumulation)
    # -> relaxed tolerance vs the f32 reference.
    np.testing.assert_allclose(np.asarray(out_nchw), np.asarray(ref),
                               rtol=5e-2, atol=3e-3)
    print("KERNEL_OK")
</pallas_src>

<mosaic_0001>
module attributes {stable_mosaic.version = 11 : i64} {
  func.func @_conv12_kernel(%arg0: i32, %arg1: memref<256x64xbf16, #tpu.memory_space<vmem>>, %arg2: memref<64x512xbf16, #tpu.memory_space<vmem>>, %arg3: memref<1x512xf32, #tpu.memory_space<vmem>>, %arg4: memref<512x512xbf16, #tpu.memory_space<vmem>>, %arg5: memref<1x512xf32, #tpu.memory_space<vmem>>, %arg6: memref<256x512xbf16, #tpu.memory_space<vmem>>) attributes {dimension_semantics = [#tpu.dimension_semantics<parallel>], iteration_bounds = array<i64: 2>, scalar_prefetch = 0 : i64, scratch_operands = 0 : i64, tpu.core_type = #tpu.core_type<tc>, window_params = [{transform_indices = @transform_0, window_bounds = array<i64: 256, 64>}, {pipeline_mode = #tpu.pipeline_mode<synchronous>, transform_indices = @transform_1, window_bounds = array<i64: 64, 512>}, {pipeline_mode = #tpu.pipeline_mode<synchronous>, transform_indices = @transform_2, window_bounds = array<i64: 1, 512>}, {pipeline_mode = #tpu.pipeline_mode<synchronous>, transform_indices = @transform_3, window_bounds = array<i64: 512, 512>}, {pipeline_mode = #tpu.pipeline_mode<synchronous>, transform_indices = @transform_4, window_bounds = array<i64: 1, 512>}, {transform_indices = @transform_5, window_bounds = array<i64: 256, 512>}]} {
    %c0 = arith.constant 0 : index
    %c0_0 = arith.constant 0 : index
    %0 = vector.load %arg1[%c0, %c0_0] : memref<256x64xbf16, #tpu.memory_space<vmem>>, vector<256x64xbf16>
    %c0_1 = arith.constant 0 : index
    %c0_2 = arith.constant 0 : index
    %1 = vector.load %arg2[%c0_1, %c0_2] : memref<64x512xbf16, #tpu.memory_space<vmem>>, vector<64x512xbf16>
    %cst = arith.constant dense<0.000000e+00> : vector<256x512xf32>
    %2 = tpu.matmul %0, %1, %cst {dimension_numbers = #tpu.dot_dimension_numbers<[1], [0], [0], [1], [0, 0, 1, 1], [], []>} : vector<256x64xbf16>, vector<64x512xbf16>, vector<256x512xf32> -> vector<256x512xf32>
    %c0_3 = arith.constant 0 : index
    %c0_4 = arith.constant 0 : index
    %3 = vector.load %arg3[%c0_3, %c0_4] : memref<1x512xf32, #tpu.memory_space<vmem>>, vector<1x512xf32>
    %4 = vector.broadcast %3 : vector<1x512xf32> to vector<256x512xf32>
    %5 = arith.addf %2, %4 : vector<256x512xf32>
    %cst_5 = arith.constant 0.000000e+00 : f32
    %6 = vector.broadcast %cst_5 : f32 to vector<256x512xf32>
    %7 = arith.maximumf %5, %6 : vector<256x512xf32>
    %8 = arith.truncf %7 : vector<256x512xf32> to vector<256x512xbf16>
    %c0_6 = arith.constant 0 : index
    %c0_7 = arith.constant 0 : index
    %9 = vector.load %arg4[%c0_6, %c0_7] : memref<512x512xbf16, #tpu.memory_space<vmem>>, vector<512x512xbf16>
    %cst_8 = arith.constant dense<0.000000e+00> : vector<256x512xf32>
    %10 = tpu.matmul %8, %9, %cst_8 {dimension_numbers = #tpu.dot_dimension_numbers<[1], [0], [0], [1], [0, 0, 1, 1], [], []>} : vector<256x512xbf16>, vector<512x512xbf16>, vector<256x512xf32> -> vector<256x512xf32>
    %c0_9 = arith.constant 0 : index
    %c0_10 = arith.constant 0 : index
    %11 = vector.load %arg5[%c0_9, %c0_10] : memref<1x512xf32, #tpu.memory_space<vmem>>, vector<1x512xf32>
    %12 = vector.broadcast %11 : vector<1x512xf32> to vector<256x512xf32>
    %13 = arith.addf %10, %12 : vector<256x512xf32>
    %cst_11 = arith.constant 0.000000e+00 : f32
    %14 = vector.broadcast %cst_11 : f32 to vector<256x512xf32>
    %15 = arith.maximumf %13, %14 : vector<256x512xf32>
    %16 = arith.truncf %15 : vector<256x512xf32> to vector<256x512xbf16>
    %c0_12 = arith.constant 0 : index
    %c0_13 = arith.constant 0 : index
    %17 = vector.load %arg6[%c0_12, %c0_13] : memref<256x512xbf16, #tpu.memory_space<vmem>>, vector<256x512xbf16>
    tpu.vector_store %arg6[%c0_12, %c0_13], %16 {strides = array<i32>} : memref<256x512xbf16, #tpu.memory_space<vmem>>, vector<256x512xbf16>,
    return
  }
  func.func @transform_0(%arg0: i32) -> (i32, i32) {
    %c0_i32 = arith.constant 0 : i32
    %c0_i32_0 = arith.constant 0 : i32
    return %arg0, %c0_i32 : i32, i32
  }
  func.func @transform_1(%arg0: i32) -> (i32, i32) {
    %c0_i32 = arith.constant 0 : i32
    %c0_i32_0 = arith.constant 0 : i32
    %c0_i32_1 = arith.constant 0 : i32
    return %c0_i32, %c0_i32_0 : i32, i32
  }
  func.func @transform_2(%arg0: i32) -> (i32, i32) {
    %c0_i32 = arith.constant 0 : i32
    %c0_i32_0 = arith.constant 0 : i32
    %c0_i32_1 = arith.constant 0 : i32
    return %c0_i32, %c0_i32_0 : i32, i32
  }
  func.func @transform_3(%arg0: i32) -> (i32, i32) {
    %c0_i32 = arith.constant 0 : i32
    %c0_i32_0 = arith.constant 0 : i32
    %c0_i32_1 = arith.constant 0 : i32
    return %c0_i32, %c0_i32_0 : i32, i32
  }
  func.func @transform_4(%arg0: i32) -> (i32, i32) {
    %c0_i32 = arith.constant 0 : i32
    %c0_i32_0 = arith.constant 0 : i32
    %c0_i32_1 = arith.constant 0 : i32
    return %c0_i32, %c0_i32_0 : i32, i32
  }
  func.func @transform_5(%arg0: i32) -> (i32, i32) {
    %c0_i32 = arith.constant 0 : i32
    %c0_i32_0 = arith.constant 0 : i32
    return %arg0, %c0_i32 : i32, i32
  }
}

</mosaic_0001>

<bundles_post_ra>
// kernel: tpu_custom_call.1
= control target key start
LH: loop header
LB: loop body
LE: loop exit
PB: predicated region body
PF: predicated region fallthrough
CT: control target
= control target key end

     0   :  { %10 = vsyncpa [#allocation3], 0  ;;  %s5097_s0 = inlined_call_operand.vmem [shape: bf16[512,64], index: 0, kind: input, shape index: {}]   ;;  %s5098_s1 = inlined_call_operand.vmem [shape: bf16[64,512], index: 1, kind: input, shape index: {}]   ;;  %s5099_s2 = inlined_call_operand.vmem [shape: f32[1,512], index: 2, kind: input, shape index: {}]   ;;  %s5100_s3 = inlined_call_operand.hbm [shape: bf16[512,512], index: 3, kind: input, shape index: {}]   ;;  %s5101_s4 = inlined_call_operand.vmem [shape: f32[1,512], index: 4, kind: input, shape index: {}]   ;;  %s5102_s5 = inlined_call_operand.hbm [shape: bf16[512,512], index: 5, kind: output, shape index: {}]  }
   0x1   :  { %11 = vsyncpa [#allocation4], 0 }
   0x2   :  { %13 = vsyncpa [#allocation4 + $0x1], 0  ;;  %s4339_s18 = smov 0   ;;  %s4341_s19 = smov 0  }
   0x3   :  { %s4343_s20 = smov 0   ;;  %s4345_s21 = smov 0  }
   0x4 LB: > { %s4360_s22 = sadd.s32 4294967295, %s4300_s21   ;;  %s3326_s23 = sadd.s32 4294967294, %s4300_s21   ;;  %s4300_s21 = sphi %s4345_s21, %s5118_s21   ;;  %s4296_s20 = sphi %s4343_s20, %s5117_s20   ;;  %s4292_s19 = sphi %s4341_s19, %s5116_s19   ;;  %s4288_s18 = sphi %s4339_s18, %s5115_s18  }
   0x5   : > { %s4364_s24 = sadd.s32 1, %s4300_s21   ;;  %s136_s25 = sadd.s32 1, %s4296_s20 }
   0x6   : > { %s133_s26 = ssub.s32 %s4300_s21, %s4364_s24  ;;  %p146_p0 = scmp.ne.s32.totalorder %s4296_s20, %s4292_s19 }
   0x7   : > { %p134_p1 = scmp.eq.s32.totalorder %s133_s26, 0  ;;  %p147_p2 = scmp.eq.s32.totalorder %s4360_s22, 1 }
   0x8   : > { %p152_p3 = scmp.ne.s32.totalorder %s4292_s19, %s4288_s18  ;;  %p153_p4 = scmp.eq.s32.totalorder %s3326_s23, 1 }
   0x9   : > { %s4375_s27 = scalar_select %p134_p1, %s4296_s20, %s136_s25  }
   0xa   : > { %p4377_p5 = por %p147_p2, %p146_p0  ;;  %p4381_p6 = por %p153_p4, %p152_p3 }
   0xb   : > { %p3327_p7 = scmp.ge.s32.totalorder %s4300_s21, 1  ;;  %p160_p8 = scmp.lt.s32.totalorder %s4300_s21, 3 }
   0xc   : > { %s5106_s28 = scalar_select %p4377_p5, 1, 0 }
   0xd   : > { %s5107_s29 = scalar_select %p4381_p6, 1, 0 }
   0xe   : > { %p5103_p9 = scmp.eq.s32.totalorder %s4360_s22, 0  ;;  %p4388_p10 = pnand %p3327_p7, %p160_p8 }
   0xf   : > { %s4302_s6 = smov [#allocation2]   ;;  %s4206_s11 = scalar_lea.hbm %s5100_s3, 16384 }
  0x10   : > { %s5108_s30 = scalar_select %p4388_p10, 1, 0 }
  0x11   : > { %s178_s7 = sshll.u32 %s4302_s6, 4  ;;  %p3925_p11 = pneg %p4388_p10  ;;  %s179_s7 = int_to_ptr.vmem [resolvable:$true] %s178_s7 }
  0x12   : > { %p4207_p13 = scmp.ne.s32.totalorder %s5100_s3, %s4206_s11  ;;  %p4213_p3 = scmp.lt.u32.totalorder %s4206_s11, %s5100_s3 }
  0x13   : > { %p4396_p12 = pnand %p5103_p9, %p3925_p11 }
  0x15   : > { %p4208_p0 = pneg %p4396_p12 }
  0x17   : > { %p4209_p1 = pnand %p4208_p0, %p4207_p13 }
  0x19   : > { %p4210_p2 = pneg %p4209_p1 }
  0x1b   : > { %p4215_p4 = pnand %p4213_p3, %p4210_p2 }
  0x1d   : > { %4218 = shalt.err (!%p4215_p4)
}
  0x1e   : > { %s4219_s16 = scalar_lea.vmem %s179_s7, 16384  ;;  %p4227_p9 = scmp.lt.s32.totalorder %s179_s7, %s179_s7 }
  0x1f   : > { %p4220_p7 = scmp.ne.s32.totalorder %s179_s7, %s4219_s16  ;;  %p4228_p6 = scmp.lt.s32.totalorder %s4219_s16, %s4219_s16 }
  0x21   : > { %p4222_p8 = pnand %p4220_p7, %p4208_p0  ;;  %p4229_p5 = por %p4228_p6, %p4227_p9 }
  0x23   : > { %p4223_p11 = pneg %p4222_p8 }
  0x25   : > { %p4230_p10 = pnand %p4229_p5, %p4223_p11 }
  0x27   : > { %4233 = shalt.err (!%p4230_p10)
}
  0x28   : > { %s4303_s17 = smov 256   ;;  %s4304_s23 = smov 16  }
  0x29   : > { %3928 = dma.hbm_to_vmem [thread:$0]  (!%p4396_p12), %s5100_s3, 16384, %s179_s7, [#allocation3], %s4303_s17, %s4303_s17, %s4304_s23  }
  0x2a   : > { %p5110_p13 = scmp.ne.s32.totalorder %s5108_s30, 0 }
  0x2b   : > { %p5111_p1 = scmp.eq.s32.totalorder (!%p5110_p13), %s4360_s22, 0 }
  0x2c   : > { %206 = sbr.rel (%p5110_p13) target bundleno = 776 (0x308), region = 40 }
  0x33   : > { %4279 = dma.done.wait (%p5111_p1), [#allocation3], 16384   ;;  %p5112_p0 = pmov %p5111_p1 }
  0x34   : > { %s3333_s6 = sshll.u32 %s4360_s22, 5  ;;  %v4305_v0 = vmov 0   ;;  %v3974_v1 = vld [vmem:[%s5098_s1 + $0x4] ss:$16 sps:$4 sm:$0xff]   ;;  %v3976_v2 = vld [vmem:[%s5098_s1] ss:$16 sps:$4 sm:$0xff]  }
  0x35   : > { %4281 = vsyncadd (%p5112_p0), [#allocation3], 4294950912  ;;  %553 = vmatprep.mubr.bf16.mxu0 %v4305_v0  ;;  %p235_p5 = scmp.lt.s32.totalorder %s3333_s6, 63  ;;  %746 = vmatprep.mubr.bf16.mxu1 %v4305_v0  ;;  %v3977_v3 = vld [vmem:[%s5098_s1 + $0x24] ss:$16 sps:$4 sm:$0xff]   ;;  %vm472_vm0 = vcmask 523264  }
  0x36   : > { %521 = vmatprep.subr.bf16.mxu0 %v3974_v1  ;;  %v3979_v4 = vld [vmem:[%s5098_s1 + $0x20] ss:$16 sps:$4 sm:$0xff]   ;;  %v3980_v5 = vld [vmem:[%s5098_s1 + $0x44] ss:$16 sps:$4 sm:$0xff]   ;;  %v3996_v10 = vld [vmem:[%s5098_s1 + $0xc] ss:$16 sps:$4 sm:$0xff]  }
  0x37   : > { %s5120_s6 = smov (!%p235_p5, %s3333_s6), 63  ;;  %522 = vmatpush1.bf16.msra.mxu0 %v3976_v2  ;;  %v3982_v6 = vld [vmem:[%s5098_s1 + $0x40] ss:$16 sps:$4 sm:$0xff]   ;;  %v3983_v7 = vld [vmem:[%s5098_s1 + $0x64] ss:$16 sps:$4 sm:$0xff]   ;;  %714 = vmatprep.subr.bf16.mxu1 %v3996_v10  ;;  %s231_s14 = sand.u32 1, %s4292_s19  }
  0x38   : > { %s3334_s10 = sshll.u32 %s5120_s6, 2  ;;  %523 = vmatprep.subr.bf16.mxu0 %v3977_v3  ;;  %v3985_v8 = vld [vmem:[%s5098_s1 + $0x60] ss:$16 sps:$4 sm:$0xff]   ;;  %v3998_v11 = vld [vmem:[%s5098_s1 + $0x8] ss:$16 sps:$4 sm:$0xff]   ;;  %s3332_s15 = sshll.u32 %s231_s14, 9 }
  0x39   : > { %s4443_s25 = scalar_lea.vmem %s5097_s0, %s3334_s10  ;;  %v3999_v12 = vld [vmem:[%s5098_s1 + $0x2c] ss:$16 sps:$4 sm:$0xff]   ;;  %715 = vmatpush1.bf16.msra.mxu1 %v3998_v11  ;;  %v4002_v13 = vld [vmem:[%s5098_s1 + $0x28] ss:$16 sps:$4 sm:$0xff]   ;;  %v4012_v18 = vld [vmem:[#allocation2 + $0x4] ss:$16 sps:$4 sm:$0xff]  }
  0x3a   : > { %v3986_v9 = vld [vmem:[%s4443_s25] sm:$0xff]   ;;  %716 = vmatprep.subr.bf16.mxu1 %v3999_v12  ;;  %v4003_v14 = vld [vmem:[%s5098_s1 + $0x4c] ss:$16 sps:$4 sm:$0xff]   ;;  %v4005_v16 = vld [vmem:[%s5098_s1 + $0x48] ss:$16 sps:$4 sm:$0xff]   ;;  %s4859_s16 = scalar_lea.vmem [#allocation5], %s3332_s15 }
  0x3b   : > { %524 = vmatpush1.bf16.msra.mxu0 %v3979_v4  ;;  %v3987_v15 = vld [vmem:[%s4443_s25 + $0x8] sm:$0xff]   ;;  %v4010_v19 = vld [vmem:[#allocation2] ss:$16 sps:$4 sm:$0xff]   ;;  %v4019_v21 = vld [vmem:[#allocation2 + $0x24] ss:$16 sps:$4 sm:$0xff]   ;;  %s3662_s17 = sshll.u32 %s4360_s22, 13 }
  0x3c   : > { %525 = vmatprep.subr.bf16.mxu0 %v3980_v5  ;;  %v4006_v17 = vld [vmem:[%s5098_s1 + $0x6c] ss:$16 sps:$4 sm:$0xff]   ;;  %v4009_v20 = vld [vmem:[%s5098_s1 + $0x68] ss:$16 sps:$4 sm:$0xff]   ;;  %v4017_v23 = vld [vmem:[#allocation2 + $0x20] ss:$16 sps:$4 sm:$0xff]   ;;  %s5046_s8 = scalar_lea.hbm %s5102_s5, %s3662_s17 }
  0x3d   : > { %717 = vmatpush1.bf16.msra.mxu1 %v4002_v13  ;;  %v4015_v22 = vld [vmem:[#allocation2 + $0xc] ss:$16 sps:$4 sm:$0xff]   ;;  %v3988_v24 = vld [vmem:[%s4443_s25 + $0x10] sm:$0xff]   ;;  %v4013_v25 = vld [vmem:[#allocation2 + $0x8] ss:$16 sps:$4 sm:$0xff]   ;;  %s3252_s23 = sshll.u32 %s4859_s16, 4  ;;  %s5048_s23 = int_to_ptr.vmem [resolvable:$true] %s3252_s23 }
  0x3e   : > { %718 = vmatprep.subr.bf16.mxu1 %v4003_v14  ;;  %v4026_v26 = vld [vmem:[#allocation2 + $0x44] ss:$16 sps:$4 sm:$0xff]   ;;  %v4022_v27 = vld [vmem:[#allocation2 + $0x2c] ss:$16 sps:$4 sm:$0xff]   ;;  %v4024_v28 = vld [vmem:[#allocation2 + $0x40] ss:$16 sps:$4 sm:$0xff]  }
  0x3f   : > { %526 = vmatpush1.bf16.msra.mxu0 %v3982_v6  ;;  %v4033_v29 = vld [vmem:[#allocation2 + $0x64] ss:$16 sps:$4 sm:$0xff]   ;;  %v4020_v30 = vld [vmem:[#allocation2 + $0x28] ss:$16 sps:$4 sm:$0xff]   ;;  %v4029_v31 = vld [vmem:[#allocation2 + $0x4c] ss:$16 sps:$4 sm:$0xff]  }
  0x40   : > { %527 = vmatprep.subr.bf16.mxu0 %v3983_v7  ;;  %v4031_v32 = vld [vmem:[#allocation2 + $0x60] ss:$16 sps:$4 sm:$0xff]   ;;  %v3989_v33 = vld [vmem:[%s4443_s25 + $0x18] sm:$0xff]   ;;  %v4040_v36 = vld [vmem:[#allocation2 + $0x84] ss:$16 sps:$4 sm:$0xff]   ;;  %s5056_s22 = scalar_lea.sflag [#allocation4], %s231_s14 }
  0x41   : > { %719 = vmatpush1.bf16.msra.mxu1 %v4005_v16  ;;  %v4027_v34 = vld [vmem:[#allocation2 + $0x48] ss:$16 sps:$4 sm:$0xff]   ;;  %v4036_v35 = vld [vmem:[#allocation2 + $0x6c] ss:$16 sps:$4 sm:$0xff]   ;;  %v4038_v37 = vld [vmem:[#allocation2 + $0x80] ss:$16 sps:$4 sm:$0xff]  }
  0x42   : > { %720 = vmatprep.subr.bf16.mxu1 %v4006_v17  ;;  %v4046_v38 = vld [vmem:[#allocation2 + $0xa4] ss:$16 sps:$4 sm:$0xff]   ;;  %v4034_v39 = vld [vmem:[#allocation2 + $0x68] ss:$16 sps:$4 sm:$0xff]   ;;  %v4043_v40 = vld [vmem:[#allocation2 + $0x8c] ss:$16 sps:$4 sm:$0xff]  }
  0x43   : > { %528 = vmatpush1.bf16.msra.mxu0 %v3985_v8  ;;  %v4044_v41 = vld [vmem:[#allocation2 + $0xa0] ss:$16 sps:$4 sm:$0xff]   ;;  %v4041_v43 = vld [vmem:[#allocation2 + $0x88] ss:$16 sps:$4 sm:$0xff]   ;;  %v4049_v44 = vld [vmem:[#allocation2 + $0xac] ss:$16 sps:$4 sm:$0xff]  }
  0x44   : > { %1889 = vmatprep.subr.bf16.mxu0 %v4012_v18  ;;  %v3990_v42 = vld [vmem:[%s4443_s25 + $0x20] sm:$0xff]   ;;  %v4047_v48 = vld [vmem:[#allocation2 + $0xa8] ss:$16 sps:$4 sm:$0xff]   ;;  %v4055_v49 = vld [vmem:[#allocation2 + $0xcc] ss:$16 sps:$4 sm:$0xff]   ;;  %s4234_s7 = scalar_lea.vmem %s5048_s23, 8192 }
  0x45   : > { %721 = vmatpush1.bf16.msra.mxu1 %v4009_v20  ;;  %v4052_v45 = vld [vmem:[#allocation2 + $0xc4] ss:$16 sps:$4 sm:$0xff]   ;;  %v4050_v46 = vld [vmem:[#allocation2 + $0xc0] ss:$16 sps:$4 sm:$0xff]   ;;  %v3991_v51 = vld [vmem:[%s4443_s25 + $0x28] sm:$0xff]   ;;  %p4235_p6 = scmp.ne.s32.totalorder %s5048_s23, %s4234_s7  ;;  %p5113_p9 = scmp.ne.s32.totalorder %s5106_s28, 0 }
  0x46   : > { %3367 = vmatmul.mubr.msk.bf16.vlgmr.msra.gmra.mrb[0].mxu0 %vm472_vm0, %v3986_v9  ;;  %2275 = vmatprep.subr.bf16.mxu1 %v4015_v22  ;;  %v4058_v47 = vld [vmem:[#allocation2 + $0xe4] ss:$16 sps:$4 sm:$0xff]   ;;  %v4056_v50 = vld [vmem:[#allocation2 + $0xe0] ss:$16 sps:$4 sm:$0xff]   ;;  %v4053_v52 = vld [vmem:[#allocation2 + $0xc8] ss:$16 sps:$4 sm:$0xff]  }
  0x47   : > { %563 = vmatprep.mubr.bf16.mxu0 %v4305_v0  ;;  %1890 = vmatpush1.bf16.msra.mxu0 %v4010_v19  ;;  %v4061_v53 = vld [vmem:[#allocation2 + $0xec] ss:$16 sps:$4 sm:$0xff]   ;;  %v4064_v54 = vld [vmem:[#allocation2 + $0x104] ss:$16 sps:$4 sm:$0xff]   ;;  %v4062_v55 = vld [vmem:[#allocation2 + $0x100] ss:$16 sps:$4 sm:$0xff]   ;;  %p4236_p10 = pnand %p4235_p6, %p5113_p9 }
  0x48   : > { %1891 = vmatprep.subr.bf16.mxu0 %v4019_v21  ;;  %3383 = vmatmul.mubr.msk.bf16.vlgmr.msra.gmra.mrb[0].mxu1 %vm472_vm0, %v3986_v9  ;;  %v4070_v56 = vld [vmem:[#allocation2 + $0x124] ss:$16 sps:$4 sm:$0xff]   ;;  %v4059_v57 = vld [vmem:[#allocation2 + $0xe8] ss:$16 sps:$4 sm:$0xff]   ;;  %v4067_v58 = vld [vmem:[#allocation2 + $0x10c] ss:$16 sps:$4 sm:$0xff]  }
  0x49   : > { %2276 = vmatpush1.bf16.msra.mxu1 %v4013_v25  ;;  %756 = vmatprep.mubr.bf16.mxu1 %v4305_v0  ;;  %v4068_v59 = vld [vmem:[#allocation2 + $0x120] ss:$16 sps:$4 sm:$0xff]   ;;  %v4065_v61 = vld [vmem:[#allocation2 + $0x108] ss:$16 sps:$4 sm:$0xff]   ;;  %v4073_v62 = vld [vmem:[#allocation2 + $0x12c] ss:$16 sps:$4 sm:$0xff]   ;;  %p4237_p12 = pneg %p4236_p10 }
  0x4a   : > { %2277 = vmatprep.subr.bf16.mxu1 %v4022_v27  ;;  %v3992_v60 = vld [vmem:[%s4443_s25 + $0x30] sm:$0xff]   ;;  %v4071_v2 = vld [vmem:[#allocation2 + $0x128] ss:$16 sps:$4 sm:$0xff]   ;;  %v4079_v4 = vld [vmem:[#allocation2 + $0x14c] ss:$16 sps:$4 sm:$0xff]   ;;  %s4306_s30 = smov [#allocation5]  }
  0x4b   : > { %1892 = vmatpush1.bf16.msra.mxu0 %v4017_v23  ;;  %v4076_v63 = vld [vmem:[#allocation2 + $0x144] ss:$16 sps:$4 sm:$0xff]   ;;  %v4074_v1 = vld [vmem:[#allocation2 + $0x140] ss:$16 sps:$4 sm:$0xff]   ;;  %v3993_v6 = vld [vmem:[%s4443_s25 + $0x38] sm:$0xff]   ;;  %s4238_s9 = sshll.u32 %s4306_s30, 4  ;;  %s4239_s9 = int_to_ptr.vmem [resolvable:$false] %s4238_s9 }
  0x4c   : > { %1893 = vmatprep.subr.bf16.mxu0 %v4026_v26  ;;  %v4082_v3 = vld [vmem:[#allocation2 + $0x164] ss:$16 sps:$4 sm:$0xff]   ;;  %v4080_v5 = vld [vmem:[#allocation2 + $0x160] ss:$16 sps:$4 sm:$0xff]   ;;  %v4077_v7 = vld [vmem:[#allocation2 + $0x148] ss:$16 sps:$4 sm:$0xff]   ;;  %p4241_p2 = scmp.lt.s32.totalorder %s5048_s23, %s4239_s9 }
  0x4d   : > { %2278 = vmatpush1.bf16.msra.mxu1 %v4020_v30  ;;  %v4088_v8 = vld [vmem:[#allocation2 + $0x184] ss:$16 sps:$4 sm:$0xff]   ;;  %v4085_v9 = vld [vmem:[#allocation2 + $0x16c] ss:$16 sps:$4 sm:$0xff]   ;;  %v4086_v10 = vld [vmem:[#allocation2 + $0x180] ss:$16 sps:$4 sm:$0xff]  }
  0x4e   : > { %3368 = vmatmul.mubr.msk.bf16.gmra.mrb[4].mxu0 %vm472_vm0, %v3987_v15  ;;  %2279 = vmatprep.subr.bf16.mxu1 %v4029_v31  ;;  %v4094_v11 = vld [vmem:[#allocation2 + $0x1a4] ss:$16 sps:$4 sm:$0xff]   ;;  %v4083_v12 = vld [vmem:[#allocation2 + $0x168] ss:$16 sps:$4 sm:$0xff]   ;;  %v4091_v13 = vld [vmem:[#allocation2 + $0x18c] ss:$16 sps:$4 sm:$0xff]  }
  0x4f   : > { %573 = vmatprep.mubr.bf16.mxu0 %v4305_v0  ;;  %1894 = vmatpush1.bf16.msra.mxu0 %v4024_v28  ;;  %v4092_v14 = vld [vmem:[#allocation2 + $0x1a0] ss:$16 sps:$4 sm:$0xff]   ;;  %v4089_v16 = vld [vmem:[#allocation2 + $0x188] ss:$16 sps:$4 sm:$0xff]   ;;  %v4100_v17 = vld [vmem:[#allocation2 + $0x1c4] ss:$16 sps:$4 sm:$0xff]  }
  0x50   : > { %1895 = vmatprep.subr.bf16.mxu0 %v4033_v29  ;;  %3384 = vmatmul.mubr.msk.bf16.gmra.mrb[4].mxu1 %vm472_vm0, %v3987_v15  ;;  %v3994_v15 = vld [vmem:[%s4443_s25 + $0x40] sm:$0xff]   ;;  %v4097_v18 = vld [vmem:[#allocation2 + $0x1ac] ss:$16 sps:$4 sm:$0xff]   ;;  %v4095_v20 = vld [vmem:[#allocation2 + $0x1a8] ss:$16 sps:$4 sm:$0xff]   ;;  %s4240_s10 = scalar_lea.vmem %s4239_s9, 16384 }
  0x51   : > { %766 = vmatprep.mubr.bf16.mxu1 %v4305_v0  ;;  %2280 = vmatpush1.bf16.msra.mxu1 %v4027_v34  ;;  %v4098_v19 = vld [vmem:[#allocation2 + $0x1c0] ss:$16 sps:$4 sm:$0xff]   ;;  %v4103_v21 = vld [vmem:[#allocation2 + $0x1cc] ss:$16 sps:$4 sm:$0xff]   ;;  %v4101_v23 = vld [vmem:[#allocation2 + $0x1c8] ss:$16 sps:$4 sm:$0xff]   ;;  %p4242_p3 = scmp.lt.s32.totalorder %s4240_s10, %s4234_s7 }
  0x52   : > { %2281 = vmatprep.subr.bf16.mxu1 %v4036_v35  ;;  %v3995_v22 = vld [vmem:[%s4443_s25 + $0x48] sm:$0xff]   ;;  %v4008_v25 = vld [vmem:[%s4443_s25 + $0x58] sm:$0xff]   ;;  %v4106_v26 = vld [vmem:[#allocation2 + $0x1e4] ss:$16 sps:$4 sm:$0xff]  }
  0x53   : > { %1896 = vmatpush1.bf16.msra.mxu0 %v4031_v32  ;;  %v4109_v27 = vld [vmem:[#allocation2 + $0x1ec] ss:$16 sps:$4 sm:$0xff]   ;;  %v4104_v28 = vld [vmem:[#allocation2 + $0x1e0] ss:$16 sps:$4 sm:$0xff]   ;;  %v4107_v29 = vld [vmem:[#allocation2 + $0x1e8] ss:$16 sps:$4 sm:$0xff]   ;;  %p4243_p4 = por %p4242_p3, %p4241_p2 }
  0x54   : > { %1897 = vmatprep.subr.bf16.mxu0 %v4040_v36  ;;  %v4016_v30 = vld [vmem:[%s4443_s25 + $0x60] sm:$0xff]   ;;  %v4115_v32 = vld [vmem:[#allocation2 + $0x20c] ss:$16 sps:$4 sm:$0xff]   ;;  %v4030_v34 = vld [vmem:[%s4443_s25 + $0x70] sm:$0xff]   ;;  %v292_v36 = vlaneseq }
  0x55   : > { %2282 = vmatpush1.bf16.msra.mxu1 %v4034_v39  ;;  %v4112_v31 = vld [vmem:[#allocation2 + $0x204] ss:$16 sps:$4 sm:$0xff]   ;;  %v4037_v35 = vld [vmem:[%s4443_s25 + $0x78] sm:$0xff]   ;;  %v290_v39 = vld [vmem:[%s5099_s2] sm:$0xf]  ;;  %p4244_p7 = pnand %p4243_p4, %p4237_p12 }
  0x56   : > { %3369 = vmatmul.mubr.msk.bf16.gmra.mrb[8].mxu0 %vm472_vm0, %v3988_v24  ;;  %2283 = vmatprep.subr.bf16.mxu1 %v4043_v40 }
  0x57   : > { %583 = vmatprep.mubr.bf16.mxu0 %v4305_v0  ;;  %1898 = vmatpush1.bf16.msra.mxu0 %v4038_v37  ;;  %v4556_v37 = vshrl.u32 %v292_v36, 7 }
  0x58   : > { %1899 = vmatprep.subr.bf16.mxu0 %v4046_v38  ;;  %3385 = vmatmul.mubr.msk.bf16.gmra.mrb[8].mxu1 %vm472_vm0, %v3988_v24  ;;  %v4001_v24 = vld [vmem:[%s4443_s25 + $0x50] sm:$0xff]  }
  0x59   : > { %776 = vmatprep.mubr.bf16.mxu1 %v4305_v0  ;;  %2284 = vmatpush1.bf16.msra.mxu1 %v4041_v43  ;;  %v294_v38 = vsub.s32 0, %v4556_v37  ;;  %v298_v40 = vsub.s32 1, %v4556_v37 }
  0x5a   : > { %2285 = vmatprep.subr.bf16.mxu1 %v4049_v44 }
  0x5b   : > { %1900 = vmatpush1.bf16.msra.mxu0 %v4044_v41  ;;  %v4565_v41 = vrot.slane %v290_v39, %v294_v38 }
  0x5c   : > { %1901 = vmatprep.subr.bf16.mxu0 %v4052_v45 }
  0x5d   : > { %2286 = vmatpush1.bf16.msra.mxu1 %v4047_v48 }
  0x5e   : > { %3370 = vmatmul.mubr.msk.bf16.gmra.mrb[12].mxu0 %vm472_vm0, %v3989_v33  ;;  %2287 = vmatprep.subr.bf16.mxu1 %v4055_v49 }
  0x5f   : > { %593 = vmatprep.mubr.bf16.mxu0 %v4305_v0  ;;  %1902 = vmatpush1.bf16.msra.mxu0 %v4050_v46 }
  0x60   : > { %1903 = vmatprep.subr.bf16.mxu0 %v4058_v47  ;;  %3386 = vmatmul.mubr.msk.bf16.gmra.mrb[12].mxu1 %vm472_vm0, %v3989_v33  ;;  %v4023_v33 = vld [vmem:[%s4443_s25 + $0x68] sm:$0xff]  }
  0x61   : > { %786 = vmatprep.mubr.bf16.mxu1 %v4305_v0  ;;  %2288 = vmatpush1.bf16.msra.mxu1 %v4053_v52 }
  0x62   : > { %2289 = vmatprep.subr.bf16.mxu1 %v4061_v53 }
  0x63   : > { %1904 = vmatpush1.bf16.msra.mxu0 %v4056_v50 }
  0x64   : > { %1905 = vmatprep.subr.bf16.mxu0 %v4064_v54 }
  0x65   : > { %2290 = vmatpush1.bf16.msra.mxu1 %v4059_v57  ;;  %v4110_v57 = vld [vmem:[#allocation2 + $0x200] ss:$16 sps:$4 sm:$0xff]  }
  0x66   : > { %3371 = vmatmul.mubr.msk.bf16.gmra.mrb[16].mxu0 %vm472_vm0, %v3990_v42  ;;  %2291 = vmatprep.subr.bf16.mxu1 %v4067_v58  ;;  %v4113_v58 = vld [vmem:[#allocation2 + $0x208] ss:$16 sps:$4 sm:$0xff]  }
  0x67   : > { %603 = vmatprep.mubr.bf16.mxu0 %v4305_v0  ;;  %1906 = vmatpush1.bf16.msra.mxu0 %v4062_v55 }
  0x68   : > { %1907 = vmatprep.subr.bf16.mxu0 %v4070_v56  ;;  %3387 = vmatmul.mubr.msk.bf16.gmra.mrb[16].mxu1 %vm472_vm0, %v3990_v42 }
  0x69   : > { %796 = vmatprep.mubr.bf16.mxu1 %v4305_v0  ;;  %2292 = vmatpush1.bf16.msra.mxu1 %v4065_v61  ;;  %v4118_v61 = vld [vmem:[#allocation2 + $0x224] ss:$16 sps:$4 sm:$0xff]  }
  0x6a   : > { %2293 = vmatprep.subr.bf16.mxu1 %v4073_v62  ;;  %v4121_v62 = vld [vmem:[#allocation2 + $0x22c] ss:$16 sps:$4 sm:$0xff]  }
  0x6b   : > { %1908 = vmatpush1.bf16.msra.mxu0 %v4068_v59 }
  0x6c   : > { %1909 = vmatprep.subr.bf16.mxu0 %v4076_v63  ;;  %v302_v63 = vsub.s32 2, %v4556_v37 }
  0x6d   : > { %2294 = vmatpush1.bf16.msra.mxu1 %v4071_v2 }
  0x6e   : > { %3372 = vmatmul.mubr.msk.bf16.gmra.mrb[20].mxu0 %vm472_vm0, %v3991_v51  ;;  %2295 = vmatprep.subr.bf16.mxu1 %v4079_v4 }
  0x6f   : > { %613 = vmatprep.mubr.bf16.mxu0 %v4305_v0  ;;  %1910 = vmatpush1.bf16.msra.mxu0 %v4074_v1 }
  0x70   : > { %1911 = vmatprep.subr.bf16.mxu0 %v4082_v3  ;;  %3388 = vmatmul.mubr.msk.bf16.gmra.mrb[20].mxu1 %vm472_vm0, %v3991_v51  ;;  %v306_v3 = vsub.s32 3, %v4556_v37 }
  0x71   : > { %806 = vmatprep.mubr.bf16.mxu1 %v4305_v0  ;;  %2296 = vmatpush1.bf16.msra.mxu1 %v4077_v7  ;;  %v4116_v7 = vld [vmem:[#allocation2 + $0x220] ss:$16 sps:$4 sm:$0xff]  }
  0x72   : > { %2297 = vmatprep.subr.bf16.mxu1 %v4085_v9 }
  0x73   : > { %1912 = vmatpush1.bf16.msra.mxu0 %v4080_v5 }
  0x74   : > { %1913 = vmatprep.subr.bf16.mxu0 %v4088_v8  ;;  %v4119_v8 = vld [vmem:[#allocation2 + $0x228] ss:$16 sps:$4 sm:$0xff]  }
  0x75   : > { %2298 = vmatpush1.bf16.msra.mxu1 %v4083_v12  ;;  %v4127_v12 = vld [vmem:[#allocation2 + $0x24c] ss:$16 sps:$4 sm:$0xff]  }
  0x76   : > { %3373 = vmatmul.mubr.msk.bf16.gmra.mrb[24].mxu0 %vm472_vm0, %v3992_v60  ;;  %2299 = vmatprep.subr.bf16.mxu1 %v4091_v13  ;;  %v4583_v13 = vrot.slane %v290_v39, %v302_v63 }
  0x77   : > { %623 = vmatprep.mubr.bf16.mxu0 %v4305_v0  ;;  %1914 = vmatpush1.bf16.msra.mxu0 %v4086_v10 }
  0x78   : > { %1915 = vmatprep.subr.bf16.mxu0 %v4094_v11  ;;  %3389 = vmatmul.mubr.msk.bf16.gmra.mrb[24].mxu1 %vm472_vm0, %v3992_v60  ;;  %v4124_v11 = vld [vmem:[#allocation2 + $0x244] ss:$16 sps:$4 sm:$0xff]  }
  0x79   : > { %816 = vmatprep.mubr.bf16.mxu1 %v4305_v0  ;;  %2300 = vmatpush1.bf16.msra.mxu1 %v4089_v16  ;;  %v4587_v16 = vrot.slane %v290_v39, %v306_v3 }
  0x7a   : > { %2301 = vmatprep.subr.bf16.mxu1 %v4097_v18 }
  0x7b   : > { %1916 = vmatpush1.bf16.msra.mxu0 %v4092_v14 }
  0x7c   : > { %1917 = vmatprep.subr.bf16.mxu0 %v4100_v17 }
  0x7d   : > { %2302 = vmatpush1.bf16.msra.mxu1 %v4095_v20  ;;  %v4122_v20 = vld [vmem:[#allocation2 + $0x240] ss:$16 sps:$4 sm:$0xff]  }
  0x7e   : > { %3374 = vmatmul.mubr.msk.bf16.gmra.mrb[28].mxu0 %vm472_vm0, %v3993_v6  ;;  %2303 = vmatprep.subr.bf16.mxu1 %v4103_v21  ;;  %v4125_v21 = vld [vmem:[#allocation2 + $0x248] ss:$16 sps:$4 sm:$0xff]  }
  0x7f   : > { %633 = vmatprep.mubr.bf16.mxu0 %v4305_v0  ;;  %1918 = vmatpush1.bf16.msra.mxu0 %v4098_v19 }
  0x80   : > { %3390 = vmatmul.mubr.msk.bf16.gmra.mrb[28].mxu1 %vm472_vm0, %v3993_v6  ;;  %1919 = vmatprep.subr.bf16.mxu0 %v4106_v26  ;;  %v4133_v26 = vld [vmem:[#allocation2 + $0x26c] ss:$16 sps:$4 sm:$0xff]  }
  0x81   : > { %826 = vmatprep.mubr.bf16.mxu1 %v4305_v0  ;;  %2304 = vmatpush1.bf16.msra.mxu1 %v4101_v23 }
  0x82   : > { %2305 = vmatprep.subr.bf16.mxu1 %v4109_v27 }
  0x83   : > { %1920 = vmatpush1.bf16.msra.mxu0 %v4104_v28 }
  0x84   : > { %2082 = vmatprep.subr.bf16.mxu0 %v4112_v31 }
  0x85   : > { %2306 = vmatpush1.bf16.msra.mxu1 %v4107_v29 }
  0x86   : > { %3375 = vmatmul.mubr.msk.bf16.gmra.mrb[32].mxu0 %vm472_vm0, %v3994_v15  ;;  %2468 = vmatprep.subr.bf16.mxu1 %v4115_v32 }
  0x87   : > { %643 = vmatprep.mubr.bf16.mxu0 %v4305_v0 }
  0x88   : > { %3391 = vmatmul.mubr.msk.bf16.gmra.mrb[32].mxu1 %vm472_vm0, %v3994_v15 }
  0x89   : > { %836 = vmatprep.mubr.bf16.mxu1 %v4305_v0 }
  0x8e   : > { %3376 = vmatmul.mubr.msk.bf16.gmra.mrb[36].mxu0 %vm472_vm0, %v3995_v22 }
  0x8f   : > { %653 = vmatprep.mubr.bf16.mxu0 %v4305_v0 }
  0x90   : > { %3392 = vmatmul.mubr.msk.bf16.gmra.mrb[36].mxu1 %vm472_vm0, %v3995_v22 }
  0x91   : > { %846 = vmatprep.mubr.bf16.mxu1 %v4305_v0 }
  0x96   : > { %3377 = vmatmul.mubr.msk.bf16.gmra.mrb[40].mxu0 %vm472_vm0, %v4001_v24 }
  0x97   : > { %663 = vmatprep.mubr.bf16.mxu0 %v4305_v0 }
  0x98   : > { %3393 = vmatmul.mubr.msk.bf16.gmra.mrb[40].mxu1 %vm472_vm0, %v4001_v24 }
  0x99   : > { %856 = vmatprep.mubr.bf16.mxu1 %v4305_v0 }
  0x9e   : > { %3378 = vmatmul.mubr.msk.bf16.gmra.mrb[44].mxu0 %vm472_vm0, %v4008_v25 }
  0x9f   : > { %673 = vmatprep.mubr.bf16.mxu0 %v4305_v0 }
  0xa0   : > { %3394 = vmatmul.mubr.msk.bf16.gmra.mrb[44].mxu1 %vm472_vm0, %v4008_v25  ;;  %v4130_v25 = vld [vmem:[#allocation2 + $0x264] ss:$16 sps:$4 sm:$0xff]  }
  0xa1   : > { %866 = vmatprep.mubr.bf16.mxu1 %v4305_v0 }
  0xa6   : > { %3379 = vmatmul.mubr.msk.bf16.gmra.mrb[48].mxu0 %vm472_vm0, %v4016_v30 }
  0xa7   : > { %683 = vmatprep.mubr.bf16.mxu0 %v4305_v0 }
  0xa8   : > { %3395 = vmatmul.mubr.msk.bf16.gmra.mrb[48].mxu1 %vm472_vm0, %v4016_v30 }
  0xa9   : > { %876 = vmatprep.mubr.bf16.mxu1 %v4305_v0 }
  0xae   : > { %3380 = vmatmul.mubr.msk.bf16.gmra.mrb[52].mxu0 %vm472_vm0, %v4023_v33 }
  0xaf   : > { %693 = vmatprep.mubr.bf16.mxu0 %v4305_v0 }
  0xb0   : > { %3396 = vmatmul.mubr.msk.bf16.gmra.mrb[52].mxu1 %vm472_vm0, %v4023_v33 }
  0xb1   : > { %886 = vmatprep.mubr.bf16.mxu1 %v4305_v0 }
  0xb6   : > { %3381 = vmatmul.mubr.msk.bf16.gmra.mrb[56].mxu0 %vm472_vm0, %v4030_v34 }
  0xb7   : > { %703 = vmatprep.mubr.bf16.mxu0 %v4305_v0 }
  0xb8   : > { %3397 = vmatmul.mubr.msk.bf16.gmra.mrb[56].mxu1 %vm472_vm0, %v4030_v34 }
  0xb9   : > { %896 = vmatprep.mubr.bf16.mxu1 %v4305_v0  ;;  %v4569_v0 = vrot.slane %v290_v39, %v298_v40 }
  0xbe   : > { %3382 = vmatmul.mubr.msk.bf16.gmra.mrb[60].mxu0 %vm472_vm0, %v4037_v35 }
  0xc0   : > { %3398 = vmatmul.mubr.msk.bf16.gmra.mrb[60].mxu1 %vm472_vm0, %v4037_v35  ;;  %v4128_v35 = vld [vmem:[#allocation2 + $0x260] ss:$16 sps:$4 sm:$0xff]  }
 0x119   : > { %v555_v42 = vpop.f32.mrb[0].mxu0 }
 0x11a   : > { %v556_v43 = vadd.f32 %v555_v42, %v4565_v41  ;;  %v557_v44 = vpop.f32.mrb[1].mxu0 }
 0x11b   : > { %v558_v45 = vadd.f32 %v557_v44, %v4569_v0  ;;  %v559_v46 = vpop.f32.mrb[2].mxu0  ;;  %v748_v22 = vpop.f32.mrb[0].mxu1  ;;  %v4131_v44 = vld [vmem:[#allocation2 + $0x268] ss:$16 sps:$4 sm:$0xff]  }
 0x11c   : > { %v560_v47 = vadd.f32 %v559_v46, %v4565_v41  ;;  %v561_v48 = vpop.f32.mrb[3].mxu0  ;;  %v907_v50 = vmax.f32 %v556_v43, 0.0  ;;  %v749_v27 = vadd.f32 %v748_v22, %v4583_v13  ;;  %v750_v28 = vpop.f32.mrb[1].mxu1  ;;  %v4148_v22 = vld [vmem:[#allocation2 + $0x2c4] ss:$16 sps:$4 sm:$0xff]  }
 0x11d   : > { %v562_v49 = vadd.f32 %v561_v48, %v4569_v0  ;;  %v908_v52 = vmax.f32 %v558_v45, 0.0  ;;  %v751_v31 = vadd.f32 %v750_v28, %v4587_v16  ;;  %v752_v32 = vpop.f32.mrb[2].mxu1  ;;  %v4136_v45 = vld [vmem:[#allocation2 + $0x284] ss:$16 sps:$4 sm:$0xff]  }
 0x11e   : > { %v911_v51 = vmax.f32 %v560_v47, 0.0  ;;  %v909_v36 = vmax.f32 %v749_v27, 0.0  ;;  %v753_v39 = vadd.f32 %v752_v32, %v4583_v13  ;;  %v754_v42 = vpop.f32.mrb[3].mxu1  ;;  %v4151_v27 = vld [vmem:[#allocation2 + $0x2cc] ss:$16 sps:$4 sm:$0xff]  }
 0x11f   : > { %v912_v53 = vmax.f32 %v562_v49, 0.0  ;;  %v910_v46 = vmax.f32 %v751_v31, 0.0  ;;  %v755_v47 = vadd.f32 %v754_v42, %v4587_v16 }
 0x120   : > { %v1035_v54 = vpack.c.bf16 %v911_v51, %v907_v50  ;;  %v4139_v50 = vld [vmem:[#allocation2 + $0x28c] ss:$16 sps:$4 sm:$0xff]   ;;  %v913_v51 = vmax.f32 %v753_v39, 0.0  ;;  %v4149_v39 = vld [vmem:[#allocation2 + $0x2c8] ss:$16 sps:$4 sm:$0xff]  }
 0x121   : > { %v1036_v55 = vpack.c.bf16 %v912_v53, %v908_v52  ;;  %v565_v56 = vpop.f32.mrb[4].mxu0 }
 0x122   : > { %v566_v59 = vadd.f32 %v565_v56, %v4565_v41  ;;  %v567_v60 = vpop.f32.mrb[5].mxu0  ;;  %v4597_v56 = vpack.c.bf16 %v913_v51, %v909_v36  ;;  %v4146_v36 = vld [vmem:[#allocation2 + $0x2c0] ss:$16 sps:$4 sm:$0xff]  }
 0x123   : > { %v568_v1 = vadd.f32 %v567_v60, %v4569_v0  ;;  %v569_v2 = vpop.f32.mrb[6].mxu0  ;;  %1921 = vmatprep.mubr.bf16.mxu0 %v1036_v55  ;;  %2307 = vmatprep.mubr.bf16.mxu1 %v1036_v55  ;;  %v4137_v60 = vld [vmem:[#allocation2 + $0x288] ss:$16 sps:$4 sm:$0xff]  }
 0x124   : > { %v570_v4 = vadd.f32 %v569_v2, %v4565_v41  ;;  %v571_v5 = vpop.f32.mrb[7].mxu0  ;;  %1922 = vmatmul.mubr.bf16.vlgmr.msra.gmra.mrb[64].mxu0 %v1035_v54  ;;  %2308 = vmatmul.mubr.bf16.vlgmr.msra.gmra.mrb[64].mxu1 %v1035_v54  ;;  %v915_v9 = vmax.f32 %v566_v59, 0.0  ;;  %v914_v54 = vmax.f32 %v755_v47, 0.0  ;;  %v4134_v59 = vld [vmem:[#allocation2 + $0x280] ss:$16 sps:$4 sm:$0xff]  }
 0x125   : > { %v572_v6 = vadd.f32 %v571_v5, %v4569_v0  ;;  %2083 = vmatpush1.bf16.msra.mxu0 %v4110_v57  ;;  %2469 = vmatpush1.bf16.msra.mxu1 %v4113_v58  ;;  %v916_v14 = vmax.f32 %v568_v1, 0.0  ;;  %v4145_v5 = vld [vmem:[#allocation2 + $0x2ac] ss:$16 sps:$4 sm:$0xff]  }
 0x126   : > { %v919_v10 = vmax.f32 %v570_v4, 0.0  ;;  %2084 = vmatprep.subr.bf16.mxu0 %v4118_v61  ;;  %2470 = vmatprep.subr.bf16.mxu1 %v4121_v62  ;;  %v4599_v61 = vpack.c.bf16 %v914_v54, %v910_v46  ;;  %v758_v62 = vpop.f32.mrb[4].mxu1  ;;  %v4142_v4 = vld [vmem:[#allocation2 + $0x2a4] ss:$16 sps:$4 sm:$0xff]   ;;  %v4157_v47 = vld [vmem:[#allocation2 + $0x2ec] ss:$16 sps:$4 sm:$0xff]  }
 0x127   : > { %v920_v15 = vmax.f32 %v572_v6, 0.0  ;;  %v759_v6 = vadd.f32 %v758_v62, %v4583_v13  ;;  %v4154_v46 = vld [vmem:[#allocation2 + $0x2e4] ss:$16 sps:$4 sm:$0xff]  }
 0x128   : > { %v1039_v17 = vpack.c.bf16 %v919_v10, %v915_v9 }
 0x129   : > { %v1040_v18 = vpack.c.bf16 %v920_v15, %v916_v14  ;;  %v575_v19 = vpop.f32.mrb[8].mxu0  ;;  %2085 = vmatpush1.bf16.msra.mxu0 %v4116_v7  ;;  %2471 = vmatpush1.bf16.msra.mxu1 %v4119_v8  ;;  %v760_v7 = vpop.f32.mrb[5].mxu1  ;;  %v4140_v15 = vld [vmem:[#allocation2 + $0x2a0] ss:$16 sps:$4 sm:$0xff]  }
 0x12a   : > { %v576_v23 = vadd.f32 %v575_v19, %v4565_v41  ;;  %v577_v24 = vpop.f32.mrb[9].mxu0  ;;  %2086 = vmatprep.subr.bf16.mxu0 %v4124_v11  ;;  %2472 = vmatprep.subr.bf16.mxu1 %v4127_v12  ;;  %v761_v10 = vadd.f32 %v760_v7, %v4587_v16  ;;  %v762_v11 = vpop.f32.mrb[6].mxu1 }
 0x12b   : > { %v578_v29 = vadd.f32 %v577_v24, %v4569_v0  ;;  %v579_v30 = vpop.f32.mrb[10].mxu0  ;;  %1931 = vmatprep.mubr.bf16.mxu0 %v1040_v18  ;;  %2317 = vmatprep.mubr.bf16.mxu1 %v1040_v18  ;;  %v763_v18 = vadd.f32 %v762_v11, %v4583_v13  ;;  %v764_v19 = vpop.f32.mrb[7].mxu1 }
 0x12c   : > { %v580_v33 = vadd.f32 %v579_v30, %v4565_v41  ;;  %v581_v34 = vpop.f32.mrb[11].mxu0  ;;  %1932 = vmatmul.mubr.bf16.gmra.mrb[68].mxu0 %v1039_v17  ;;  %2318 = vmatmul.mubr.bf16.gmra.mrb[68].mxu1 %v1039_v17  ;;  %v923_v48 = vmax.f32 %v576_v23, 0.0  ;;  %v917_v17 = vmax.f32 %v759_v6, 0.0  ;;  %v918_v23 = vmax.f32 %v761_v10, 0.0 }
 0x12d   : > { %v582_v43 = vadd.f32 %v581_v34, %v4569_v0  ;;  %2087 = vmatpush1.bf16.msra.mxu0 %v4122_v20  ;;  %2473 = vmatpush1.bf16.msra.mxu1 %v4125_v21  ;;  %v924_v52 = vmax.f32 %v578_v29, 0.0  ;;  %v4143_v21 = vld [vmem:[#allocation2 + $0x2a8] ss:$16 sps:$4 sm:$0xff]   ;;  %v765_v24 = vadd.f32 %v764_v19, %v4587_v16  ;;  %v921_v28 = vmax.f32 %v763_v18, 0.0  ;;  %v4158_v19 = vld [vmem:[#allocation2 + $0x300] ss:$16 sps:$4 sm:$0xff]  }
 0x12e   : > { %v927_v49 = vmax.f32 %v580_v33, 0.0  ;;  %2088 = vmatprep.subr.bf16.mxu0 %v4130_v25  ;;  %2474 = vmatprep.subr.bf16.mxu1 %v4133_v26 }
 0x12f   : > { %v928_v53 = vmax.f32 %v582_v43, 0.0  ;;  %v922_v31 = vmax.f32 %v765_v24, 0.0  ;;  %v4609_v33 = vpack.c.bf16 %v921_v28, %v917_v17  ;;  %v768_v43 = vpop.f32.mrb[8].mxu1 }
 0x130   : > { %v1043_v55 = vpack.c.bf16 %v927_v49, %v923_v48  ;;  %v769_v48 = vadd.f32 %v768_v43, %v4583_v13  ;;  %v770_v49 = vpop.f32.mrb[9].mxu1 }
 0x131   : > { %v1044_v57 = vpack.c.bf16 %v928_v53, %v924_v52  ;;  %v585_v58 = vpop.f32.mrb[12].mxu0  ;;  %2089 = vmatpush1.bf16.msra.mxu0 %v4128_v35  ;;  %2475 = vmatpush1.bf16.msra.mxu1 %v4131_v44  ;;  %v4611_v42 = vpack.c.bf16 %v922_v31, %v918_v23  ;;  %v771_v52 = vadd.f32 %v770_v49, %v4587_v16  ;;  %v772_v53 = vpop.f32.mrb[10].mxu1 }
 0x132   : > { %v586_v1 = vadd.f32 %v585_v58, %v4565_v41  ;;  %v587_v2 = vpop.f32.mrb[13].mxu0  ;;  %2090 = vmatprep.subr.bf16.mxu0 %v4136_v45  ;;  %2476 = vmatprep.subr.bf16.mxu1 %v4139_v50  ;;  %v925_v58 = vmax.f32 %v769_v48, 0.0 }
 0x133   : > { %v588_v8 = vadd.f32 %v587_v2, %v4569_v0  ;;  %v589_v9 = vpop.f32.mrb[14].mxu0  ;;  %1941 = vmatprep.mubr.bf16.mxu0 %v1044_v57  ;;  %2327 = vmatprep.mubr.bf16.mxu1 %v1044_v57  ;;  %v4152_v57 = vld [vmem:[#allocation2 + $0x2e0] ss:$16 sps:$4 sm:$0xff]   ;;  %v4160_v2 = vld [vmem:[#allocation2 + $0x304] ss:$16 sps:$4 sm:$0xff]  }
 0x134   : > { %v590_v12 = vadd.f32 %v589_v9, %v4565_v41  ;;  %v591_v14 = vpop.f32.mrb[15].mxu0  ;;  %1942 = vmatmul.mubr.bf16.gmra.mrb[72].mxu0 %v1043_v55  ;;  %2328 = vmatmul.mubr.bf16.gmra.mrb[72].mxu1 %v1043_v55  ;;  %v931_v25 = vmax.f32 %v586_v1, 0.0  ;;  %v4155_v1 = vld [vmem:[#allocation2 + $0x2e8] ss:$16 sps:$4 sm:$0xff]  }
 0x135   : > { %v592_v20 = vadd.f32 %v591_v14, %v4569_v0  ;;  %2091 = vmatpush1.bf16.msra.mxu0 %v4134_v59  ;;  %2477 = vmatpush1.bf16.msra.mxu1 %v4137_v60  ;;  %v932_v29 = vmax.f32 %v588_v8, 0.0  ;;  %v773_v59 = vadd.f32 %v772_v53, %v4583_v13  ;;  %v774_v60 = vpop.f32.mrb[11].mxu1  ;;  %v4163_v8 = vld [vmem:[#allocation2 + $0x30c] ss:$16 sps:$4 sm:$0xff]  }
 0x136   : > { %v935_v26 = vmax.f32 %v590_v12, 0.0  ;;  %2092 = vmatprep.subr.bf16.mxu0 %v4142_v4  ;;  %2478 = vmatprep.subr.bf16.mxu1 %v4145_v5  ;;  %v926_v4 = vmax.f32 %v771_v52, 0.0  ;;  %v775_v5 = vadd.f32 %v774_v60, %v4587_v16  ;;  %v4175_v52 = vld [vmem:[#allocation2 + $0x34c] ss:$16 sps:$4 sm:$0xff]  }
 0x137   : > { %v936_v30 = vmax.f32 %v592_v20, 0.0  ;;  %v929_v9 = vmax.f32 %v773_v59, 0.0  ;;  %v4161_v20 = vld [vmem:[#allocation2 + $0x308] ss:$16 sps:$4 sm:$0xff]  }
 0x138   : > { %v1047_v32 = vpack.c.bf16 %v935_v26, %v931_v25  ;;  %v930_v12 = vmax.f32 %v775_v5, 0.0  ;;  %v4166_v25 = vld [vmem:[#allocation2 + $0x324] ss:$16 sps:$4 sm:$0xff]   ;;  %v4169_v26 = vld [vmem:[#allocation2 + $0x32c] ss:$16 sps:$4 sm:$0xff]  }
 0x139   : > { %v1048_v34 = vpack.c.bf16 %v936_v30, %v932_v29  ;;  %v595_v35 = vpop.f32.mrb[16].mxu0  ;;  %2093 = vmatpush1.bf16.msra.mxu0 %v4140_v15  ;;  %2479 = vmatpush1.bf16.msra.mxu1 %v4143_v21  ;;  %v4621_v15 = vpack.c.bf16 %v929_v9, %v925_v58  ;;  %v4181_v9 = vld [vmem:[#allocation2 + $0x36c] ss:$16 sps:$4 sm:$0xff]  }
 0x13a   : > { %v596_v44 = vadd.f32 %v595_v35, %v4565_v41  ;;  %v597_v45 = vpop.f32.mrb[17].mxu0  ;;  %2094 = vmatprep.subr.bf16.mxu0 %v4148_v22  ;;  %2480 = vmatprep.subr.bf16.mxu1 %v4151_v27  ;;  %v4623_v21 = vpack.c.bf16 %v930_v12, %v926_v4  ;;  %v778_v22 = vpop.f32.mrb[12].mxu1 }
 0x13b   : > { %v598_v50 = vadd.f32 %v597_v45, %v4569_v0  ;;  %v599_v51 = vpop.f32.mrb[18].mxu0  ;;  %1951 = vmatprep.mubr.bf16.mxu0 %v1048_v34  ;;  %2337 = vmatprep.mubr.bf16.mxu1 %v1048_v34  ;;  %v779_v27 = vadd.f32 %v778_v22, %v4583_v13  ;;  %v780_v28 = vpop.f32.mrb[13].mxu1  ;;  %v4176_v22 = vld [vmem:[#allocation2 + $0x360] ss:$16 sps:$4 sm:$0xff]  }
 0x13c   : > { %v600_v54 = vadd.f32 %v599_v51, %v4565_v41  ;;  %v601_v55 = vpop.f32.mrb[19].mxu0  ;;  %1952 = vmatmul.mubr.bf16.gmra.mrb[76].mxu0 %v1047_v32  ;;  %2338 = vmatmul.mubr.bf16.gmra.mrb[76].mxu1 %v1047_v32  ;;  %v939_v6 = vmax.f32 %v596_v44, 0.0  ;;  %v781_v31 = vadd.f32 %v780_v28, %v4587_v16  ;;  %v782_v32 = vpop.f32.mrb[14].mxu1  ;;  %v4184_v28 = vld [vmem:[#allocation2 + $0x384] ss:$16 sps:$4 sm:$0xff]  }
 0x13d   : > { %v602_v62 = vadd.f32 %v601_v55, %v4569_v0  ;;  %2095 = vmatpush1.bf16.msra.mxu0 %v4146_v36  ;;  %2481 = vmatpush1.bf16.msra.mxu1 %v4149_v39  ;;  %v940_v10 = vmax.f32 %v598_v50, 0.0  ;;  %v4164_v36 = vld [vmem:[#allocation2 + $0x320] ss:$16 sps:$4 sm:$0xff]   ;;  %v933_v39 = vmax.f32 %v779_v27, 0.0  ;;  %v783_v43 = vadd.f32 %v782_v32, %v4583_v13  ;;  %v784_v44 = vpop.f32.mrb[15].mxu1 }
 0x13e   : > { %v943_v7 = vmax.f32 %v600_v54, 0.0  ;;  %2096 = vmatprep.subr.bf16.mxu0 %v4154_v46  ;;  %2482 = vmatprep.subr.bf16.mxu1 %v4157_v47  ;;  %v4167_v46 = vld [vmem:[#allocation2 + $0x328] ss:$16 sps:$4 sm:$0xff]   ;;  %v4172_v47 = vld [vmem:[#allocation2 + $0x344] ss:$16 sps:$4 sm:$0xff]   ;;  %v934_v48 = vmax.f32 %v781_v31, 0.0  ;;  %v785_v49 = vadd.f32 %v784_v44, %v4587_v16 }
 0x13f   : > { %v944_v11 = vmax.f32 %v602_v62, 0.0  ;;  %v937_v53 = vmax.f32 %v783_v43, 0.0  ;;  %v788_v5 = vpop.f32.mrb[16].mxu1  ;;  %v4179_v27 = vld [vmem:[#allocation2 + $0x368] ss:$16 sps:$4 sm:$0xff]  }
 0x140   : > { %v1051_v14 = vpack.c.bf16 %v943_v7, %v939_v6 }
 0x141   : > { %v1052_v17 = vpack.c.bf16 %v944_v11, %v940_v10  ;;  %v605_v18 = vpop.f32.mrb[20].mxu0  ;;  %2097 = vmatpush1.bf16.msra.mxu0 %v4152_v57  ;;  %2483 = vmatpush1.bf16.msra.mxu1 %v4155_v1  ;;  %v938_v57 = vmax.f32 %v785_v49, 0.0  ;;  %v4633_v59 = vpack.c.bf16 %v937_v53, %v933_v39  ;;  %v4170_v1 = vld [vmem:[#allocation2 + $0x340] ss:$16 sps:$4 sm:$0xff]   ;;  %v789_v10 = vadd.f32 %v788_v5, %v4583_v13  ;;  %v790_v11 = vpop.f32.mrb[17].mxu1 }
 0x142   : > { %v606_v23 = vadd.f32 %v605_v18, %v4565_v41  ;;  %v607_v24 = vpop.f32.mrb[21].mxu0  ;;  %2098 = vmatprep.subr.bf16.mxu0 %v4160_v2  ;;  %2484 = vmatprep.subr.bf16.mxu1 %v4163_v8  ;;  %v4173_v2 = vld [vmem:[#allocation2 + $0x348] ss:$16 sps:$4 sm:$0xff]   ;;  %v4178_v8 = vld [vmem:[#allocation2 + $0x364] ss:$16 sps:$4 sm:$0xff]   ;;  %v792_v18 = vpop.f32.mrb[18].mxu1 }
 0x143   : > { %v608_v29 = vadd.f32 %v607_v24, %v4569_v0  ;;  %v609_v30 = vpop.f32.mrb[22].mxu0  ;;  %1961 = vmatprep.mubr.bf16.mxu0 %v1052_v17  ;;  %2347 = vmatprep.mubr.bf16.mxu1 %v1052_v17  ;;  %v4635_v4 = vpack.c.bf16 %v938_v57, %v934_v48  ;;  %v791_v17 = vadd.f32 %v790_v11, %v4587_v16  ;;  %v4182_v48 = vld [vmem:[#allocation2 + $0x380] ss:$16 sps:$4 sm:$0xff]   ;;  %v4185_v49 = vld [vmem:[#allocation2 + $0x388] ss:$16 sps:$4 sm:$0xff]  }
 0x144   : > { %v610_v34 = vadd.f32 %v609_v30, %v4565_v41  ;;  %v611_v35 = vpop.f32.mrb[23].mxu0  ;;  %1962 = vmatmul.mubr.bf16.gmra.mrb[80].mxu0 %v1051_v14  ;;  %2348 = vmatmul.mubr.bf16.gmra.mrb[80].mxu1 %v1051_v14  ;;  %v947_v50 = vmax.f32 %v606_v23, 0.0  ;;  %v941_v23 = vmax.f32 %v789_v10, 0.0  ;;  %v793_v24 = vadd.f32 %v792_v18, %v4583_v13 }
 0x145   : > { %v612_v45 = vadd.f32 %v611_v35, %v4569_v0  ;;  %2099 = vmatpush1.bf16.msra.mxu0 %v4158_v19  ;;  %2485 = vmatpush1.bf16.msra.mxu1 %v4161_v20  ;;  %v948_v54 = vmax.f32 %v608_v29, 0.0  ;;  %v942_v29 = vmax.f32 %v791_v17, 0.0 }
 0x146   : > { %v951_v51 = vmax.f32 %v610_v34, 0.0  ;;  %2100 = vmatprep.subr.bf16.mxu0 %v4166_v25  ;;  %2486 = vmatprep.subr.bf16.mxu1 %v4169_v26  ;;  %v794_v25 = vpop.f32.mrb[19].mxu1  ;;  %v4187_v34 = vld [vmem:[#allocation2 + $0x38c] ss:$16 sps:$4 sm:$0xff]   ;;  %v945_v35 = vmax.f32 %v793_v24, 0.0 }
 0x147   : > { %v952_v55 = vmax.f32 %v612_v45, 0.0  ;;  %v795_v30 = vadd.f32 %v794_v25, %v4587_v16 }
 0x148   : > { %v1055_v58 = vpack.c.bf16 %v951_v51, %v947_v50  ;;  %v4645_v45 = vpack.c.bf16 %v945_v35, %v941_v23  ;;  %v798_v51 = vpop.f32.mrb[20].mxu1 }
 0x149   : > { %v1056_v60 = vpack.c.bf16 %v952_v55, %v948_v54  ;;  %v615_v62 = vpop.f32.mrb[24].mxu0  ;;  %2101 = vmatpush1.bf16.msra.mxu0 %v4164_v36  ;;  %2487 = vmatpush1.bf16.msra.mxu1 %v4167_v46  ;;  %v946_v43 = vmax.f32 %v795_v30, 0.0  ;;  %v4190_v54 = vld [vmem:[#allocation2 + $0x3a4] ss:$16 sps:$4 sm:$0xff]   ;;  %v4193_v55 = vld [vmem:[#allocation2 + $0x3ac] ss:$16 sps:$4 sm:$0xff]   ;;  %v799_v57 = vadd.f32 %v798_v51, %v4583_v13 }
 0x14a   : > { %v616_v6 = vadd.f32 %v615_v62, %v4565_v41  ;;  %v617_v7 = vpop.f32.mrb[25].mxu0  ;;  %2102 = vmatprep.subr.bf16.mxu0 %v4172_v47  ;;  %2488 = vmatprep.subr.bf16.mxu1 %v4175_v52 }
 0x14b   : > { %v618_v12 = vadd.f32 %v617_v7, %v4569_v0  ;;  %v619_v14 = vpop.f32.mrb[26].mxu0  ;;  %1971 = vmatprep.mubr.bf16.mxu0 %v1056_v60  ;;  %2357 = vmatprep.mubr.bf16.mxu1 %v1056_v60  ;;  %v4647_v50 = vpack.c.bf16 %v946_v43, %v942_v29  ;;  %v4188_v7 = vld [vmem:[#allocation2 + $0x3a0] ss:$16 sps:$4 sm:$0xff]   ;;  %v4202_v43 = vld [vmem:[#allocation2 + $0x3e4] ss:$16 sps:$4 sm:$0xff]  }
 0x14c   : > { %v620_v19 = vadd.f32 %v619_v14, %v4565_v41  ;;  %v621_v20 = vpop.f32.mrb[27].mxu0  ;;  %1972 = vmatmul.mubr.bf16.gmra.mrb[84].mxu0 %v1055_v58  ;;  %2358 = vmatmul.mubr.bf16.gmra.mrb[84].mxu1 %v1055_v58  ;;  %v955_v31 = vmax.f32 %v616_v6, 0.0  ;;  %v800_v58 = vpop.f32.mrb[21].mxu1  ;;  %v4196_v14 = vld [vmem:[#allocation2 + $0x3c4] ss:$16 sps:$4 sm:$0xff]  }
 0x14d   : > { %v622_v26 = vadd.f32 %v621_v20, %v4569_v0  ;;  %2103 = vmatpush1.bf16.msra.mxu0 %v4170_v1  ;;  %2489 = vmatpush1.bf16.msra.mxu1 %v4173_v2  ;;  %v956_v36 = vmax.f32 %v618_v12, 0.0  ;;  %v801_v1 = vadd.f32 %v800_v58, %v4587_v16  ;;  %v802_v2 = vpop.f32.mrb[22].mxu1  ;;  %v4191_v12 = vld [vmem:[#allocation2 + $0x3a8] ss:$16 sps:$4 sm:$0xff]  }
 0x14e   : > { %v959_v32 = vmax.f32 %v620_v19, 0.0  ;;  %2104 = vmatprep.subr.bf16.mxu0 %v4178_v8  ;;  %2490 = vmatprep.subr.bf16.mxu1 %v4181_v9  ;;  %v949_v8 = vmax.f32 %v799_v57, 0.0  ;;  %v803_v9 = vadd.f32 %v802_v2, %v4583_v13  ;;  %v804_v10 = vpop.f32.mrb[23].mxu1 }
 0x14f   : > { %v960_v39 = vmax.f32 %v622_v26, 0.0  ;;  %v950_v17 = vmax.f32 %v801_v1, 0.0  ;;  %v805_v18 = vadd.f32 %v804_v10, %v4587_v16  ;;  %v808_v35 = vpop.f32.mrb[24].mxu1  ;;  %v4203_v1 = vld [vmem:[#allocation2 + $0x3e8] ss:$16 sps:$4 sm:$0xff]  }
 0x150   : > { %v1059_v44 = vpack.c.bf16 %v959_v32, %v955_v31  ;;  %v953_v23 = vmax.f32 %v803_v9, 0.0  ;;  %v4194_v31 = vld [vmem:[#allocation2 + $0x3c0] ss:$16 sps:$4 sm:$0xff]   ;;  %v4197_v32 = vld [vmem:[#allocation2 + $0x3c8] ss:$16 sps:$4 sm:$0xff]  }
 0x151   : > { %v1060_v46 = vpack.c.bf16 %v960_v39, %v956_v36  ;;  %v625_v47 = vpop.f32.mrb[28].mxu0  ;;  %2105 = vmatpush1.bf16.msra.mxu0 %v4176_v22  ;;  %2491 = vmatpush1.bf16.msra.mxu1 %v4179_v27  ;;  %v4199_v22 = vld [vmem:[#allocation2 + $0x3cc] ss:$16 sps:$4 sm:$0xff]   ;;  %v954_v26 = vmax.f32 %v805_v18, 0.0 }
 0x152   : > { %v626_v52 = vadd.f32 %v625_v47, %v4565_v41  ;;  %v627_v53 = vpop.f32.mrb[29].mxu0  ;;  %2106 = vmatprep.subr.bf16.mxu0 %v4184_v28  ;;  %2492 = vmatprep.subr.bf16.mxu1 %v4187_v34  ;;  %v4657_v28 = vpack.c.bf16 %v953_v23, %v949_v8  ;;  %v810_v47 = vpop.f32.mrb[25].mxu1 }
 0x153   : > { %v628_v60 = vadd.f32 %v627_v53, %v4569_v0  ;;  %v629_v62 = vpop.f32.mrb[30].mxu0  ;;  %1981 = vmatprep.mubr.bf16.mxu0 %v1060_v46  ;;  %2367 = vmatprep.mubr.bf16.mxu1 %v1060_v46  ;;  %v4659_v34 = vpack.c.bf16 %v954_v26, %v950_v17  ;;  %v809_v46 = vadd.f32 %v808_v35, %v4583_v13 }
 0x154   : > { %v630_v5 = vadd.f32 %v629_v62, %v4565_v41  ;;  %v631_v6 = vpop.f32.mrb[31].mxu0  ;;  %1982 = vmatmul.mubr.bf16.gmra.mrb[88].mxu0 %v1059_v44  ;;  %2368 = vmatmul.mubr.bf16.gmra.mrb[88].mxu1 %v1059_v44  ;;  %v963_v19 = vmax.f32 %v626_v52, 0.0  ;;  %v4205_v44 = vld [vmem:[#allocation2 + $0x3ec] ss:$16 sps:$4 sm:$0xff]   ;;  %v811_v51 = vadd.f32 %v810_v47, %v4587_v16  ;;  %v812_v52 = vpop.f32.mrb[26].mxu1 }
 0x155   : > { %v632_v11 = vadd.f32 %v631_v6, %v4569_v0  ;;  %2107 = vmatpush1.bf16.msra.mxu0 %v4182_v48  ;;  %2493 = vmatpush1.bf16.msra.mxu1 %v4185_v49  ;;  %v964_v24 = vmax.f32 %v628_v60, 0.0  ;;  %v813_v57 = vadd.f32 %v812_v52, %v4583_v13  ;;  %v814_v58 = vpop.f32.mrb[27].mxu1  ;;  %v4200_v62 = vld [vmem:[#allocation2 + $0x3e0] ss:$16 sps:$4 sm:$0xff]  }
 0x156   : > { %v967_v20 = vmax.f32 %v630_v5, 0.0  ;;  %2108 = vmatprep.subr.bf16.mxu0 %v4190_v54  ;;  %2494 = vmatprep.subr.bf16.mxu1 %v4193_v55  ;;  %v957_v55 = vmax.f32 %v809_v46, 0.0  ;;  %v958_v2 = vmax.f32 %v811_v51, 0.0  ;;  %v815_v5 = vadd.f32 %v814_v58, %v4587_v16 }
 0x157   : > { %v968_v25 = vmax.f32 %v632_v11, 0.0  ;;  %v961_v8 = vmax.f32 %v813_v57, 0.0 }
 0x158   : > { %v1063_v27 = vpack.c.bf16 %v967_v20, %v963_v19  ;;  %v962_v11 = vmax.f32 %v815_v5, 0.0  ;;  %v818_v20 = vpop.f32.mrb[28].mxu1 }
 0x159   : > { %v1064_v29 = vpack.c.bf16 %v968_v25, %v964_v24  ;;  %v635_v30 = vpop.f32.mrb[32].mxu0  ;;  %2109 = vmatpush1.bf16.msra.mxu0 %v4188_v7  ;;  %2495 = vmatpush1.bf16.msra.mxu1 %v4191_v12  ;;  %v819_v24 = vadd.f32 %v818_v20, %v4583_v13  ;;  %v820_v25 = vpop.f32.mrb[29].mxu1 }
 0x15a   : > { %v636_v36 = vadd.f32 %v635_v30, %v4565_v41  ;;  %v637_v39 = vpop.f32.mrb[33].mxu0  ;;  %2110 = vmatprep.subr.bf16.mxu0 %v4196_v14  ;;  %2496 = vmatprep.subr.bf16.mxu1 %v4199_v22  ;;  %v4669_v14 = vpack.c.bf16 %v961_v8, %v957_v55  ;;  %v4671_v19 = vpack.c.bf16 %v962_v11, %v958_v2  ;;  %v822_v30 = vpop.f32.mrb[30].mxu1 }
 0x15b   : > { %v638_v48 = vadd.f32 %v637_v39, %v4569_v0  ;;  %v639_v49 = vpop.f32.mrb[34].mxu0  ;;  %1991 = vmatprep.mubr.bf16.mxu0 %v1064_v29  ;;  %2377 = vmatprep.mubr.bf16.mxu1 %v1064_v29  ;;  %v821_v29 = vadd.f32 %v820_v25, %v4587_v16  ;;  %v965_v35 = vmax.f32 %v819_v24, 0.0  ;;  %v824_v39 = vpop.f32.mrb[31].mxu1 }
 0x15c   : > { %v640_v53 = vadd.f32 %v639_v49, %v4565_v41  ;;  %v641_v54 = vpop.f32.mrb[35].mxu0  ;;  %1992 = vmatmul.mubr.bf16.gmra.mrb[92].mxu0 %v1063_v27  ;;  %2378 = vmatmul.mubr.bf16.gmra.mrb[92].mxu1 %v1063_v27  ;;  %v971_v6 = vmax.f32 %v636_v36, 0.0  ;;  %v823_v36 = vadd.f32 %v822_v30, %v4583_v13  ;;  %v825_v46 = vadd.f32 %v824_v39, %v4587_v16 }
 0x15d   : > { %v642_v60 = vadd.f32 %v641_v54, %v4569_v0  ;;  %2111 = vmatpush1.bf16.msra.mxu0 %v4194_v31  ;;  %2497 = vmatpush1.bf16.msra.mxu1 %v4197_v32  ;;  %v972_v9 = vmax.f32 %v638_v48, 0.0 }
 0x15e   : > { %v975_v7 = vmax.f32 %v640_v53, 0.0  ;;  %2112 = vmatprep.subr.bf16.mxu0 %v4202_v43  ;;  %2498 = vmatprep.subr.bf16.mxu1 %v4205_v44  ;;  %v966_v44 = vmax.f32 %v821_v29, 0.0  ;;  %v969_v49 = vmax.f32 %v823_v36, 0.0  ;;  %v970_v53 = vmax.f32 %v825_v46, 0.0 }
 0x15f   : > { %v976_v10 = vmax.f32 %v642_v60, 0.0 }
 0x160   : > { %v1067_v12 = vpack.c.bf16 %v975_v7, %v971_v6  ;;  %v4681_v55 = vpack.c.bf16 %v969_v49, %v965_v35  ;;  %v4683_v60 = vpack.c.bf16 %v970_v53, %v966_v44 }
 0x161   : > { %v1068_v17 = vpack.c.bf16 %v976_v10, %v972_v9  ;;  %v645_v18 = vpop.f32.mrb[36].mxu0  ;;  %2113 = vmatpush1.bf16.msra.mxu0 %v4200_v62  ;;  %2499 = vmatpush1.bf16.msra.mxu1 %v4203_v1  ;;  %v828_v62 = vpop.f32.mrb[32].mxu1 }
 0x162   : > { %v646_v22 = vadd.f32 %v645_v18, %v4565_v41  ;;  %v647_v23 = vpop.f32.mrb[37].mxu0  ;;  %v829_v5 = vadd.f32 %v828_v62, %v4583_v13  ;;  %v830_v6 = vpop.f32.mrb[33].mxu1 }
 0x163   : > { %v648_v26 = vadd.f32 %v647_v23, %v4569_v0  ;;  %v649_v27 = vpop.f32.mrb[38].mxu0  ;;  %2001 = vmatprep.mubr.bf16.mxu0 %v1068_v17  ;;  %2387 = vmatprep.mubr.bf16.mxu1 %v1068_v17  ;;  %v831_v9 = vadd.f32 %v830_v6, %v4587_v16  ;;  %v832_v10 = vpop.f32.mrb[34].mxu1 }
 0x164   : > { %v650_v31 = vadd.f32 %v649_v27, %v4565_v41  ;;  %v651_v32 = vpop.f32.mrb[39].mxu0  ;;  %2002 = vmatmul.mubr.bf16.gmra.mrb[96].mxu0 %v1067_v12  ;;  %2388 = vmatmul.mubr.bf16.gmra.mrb[96].mxu1 %v1067_v12  ;;  %v979_v47 = vmax.f32 %v646_v22, 0.0  ;;  %v973_v17 = vmax.f32 %v829_v5, 0.0  ;;  %v833_v18 = vadd.f32 %v832_v10, %v4583_v13  ;;  %v834_v20 = vpop.f32.mrb[35].mxu1 }
 0x165   : > { %v652_v43 = vadd.f32 %v651_v32, %v4569_v0  ;;  %v980_v51 = vmax.f32 %v648_v26, 0.0  ;;  %v974_v23 = vmax.f32 %v831_v9, 0.0  ;;  %v835_v24 = vadd.f32 %v834_v20, %v4587_v16  ;;  %v838_v44 = vpop.f32.mrb[36].mxu1 }
 0x166   : > { %v983_v48 = vmax.f32 %v650_v31, 0.0  ;;  %v977_v27 = vmax.f32 %v833_v18, 0.0  ;;  %v840_v49 = vpop.f32.mrb[37].mxu1 }
 0x167   : > { %v984_v52 = vmax.f32 %v652_v43, 0.0  ;;  %v978_v31 = vmax.f32 %v835_v24, 0.0  ;;  %v841_v53 = vadd.f32 %v840_v49, %v4587_v16 }
 0x168   : > { %v1071_v54 = vpack.c.bf16 %v983_v48, %v979_v47  ;;  %v4693_v35 = vpack.c.bf16 %v977_v27, %v973_v17  ;;  %v839_v48 = vadd.f32 %v838_v44, %v4583_v13 }
 0x169   : > { %v1072_v57 = vpack.c.bf16 %v984_v52, %v980_v51  ;;  %v655_v58 = vpop.f32.mrb[40].mxu0  ;;  %v4695_v43 = vpack.c.bf16 %v978_v31, %v974_v23  ;;  %v982_v6 = vmax.f32 %v841_v53, 0.0 }
 0x16a   : > { %v656_v1 = vadd.f32 %v655_v58, %v4565_v41  ;;  %v657_v2 = vpop.f32.mrb[41].mxu0  ;;  %v981_v62 = vmax.f32 %v839_v48, 0.0 }
 0x16b   : > { %v658_v7 = vadd.f32 %v657_v2, %v4569_v0  ;;  %v659_v8 = vpop.f32.mrb[42].mxu0  ;;  %2011 = vmatprep.mubr.bf16.mxu0 %v1072_v57  ;;  %2397 = vmatprep.mubr.bf16.mxu1 %v1072_v57 }
 0x16c   : > { %v660_v11 = vadd.f32 %v659_v8, %v4565_v41  ;;  %v661_v12 = vpop.f32.mrb[43].mxu0  ;;  %2012 = vmatmul.mubr.bf16.gmra.mrb[100].mxu0 %v1071_v54  ;;  %2398 = vmatmul.mubr.bf16.gmra.mrb[100].mxu1 %v1071_v54  ;;  %v987_v25 = vmax.f32 %v656_v1, 0.0  ;;  %v842_v54 = vpop.f32.mrb[38].mxu1 }
 0x16d   : > { %v662_v22 = vadd.f32 %v661_v12, %v4569_v0  ;;  %v988_v29 = vmax.f32 %v658_v7, 0.0  ;;  %v843_v1 = vadd.f32 %v842_v54, %v4583_v13  ;;  %v844_v2 = vpop.f32.mrb[39].mxu1 }
 0x16e   : > { %v991_v26 = vmax.f32 %v660_v11, 0.0  ;;  %v845_v7 = vadd.f32 %v844_v2, %v4587_v16 }
 0x16f   : > { %v992_v30 = vmax.f32 %v662_v22, 0.0  ;;  %v985_v10 = vmax.f32 %v843_v1, 0.0 }
 0x170   : > { %v1075_v32 = vpack.c.bf16 %v991_v26, %v987_v25  ;;  %v986_v17 = vmax.f32 %v845_v7, 0.0  ;;  %v848_v25 = vpop.f32.mrb[40].mxu1 }
 0x171   : > { %v1076_v36 = vpack.c.bf16 %v992_v30, %v988_v29  ;;  %v665_v39 = vpop.f32.mrb[44].mxu0  ;;  %v4705_v20 = vpack.c.bf16 %v985_v10, %v981_v62  ;;  %v849_v29 = vadd.f32 %v848_v25, %v4583_v13  ;;  %v850_v30 = vpop.f32.mrb[41].mxu1 }
 0x172   : > { %v666_v46 = vadd.f32 %v665_v39, %v4565_v41  ;;  %v667_v47 = vpop.f32.mrb[45].mxu0  ;;  %v4707_v24 = vpack.c.bf16 %v986_v17, %v982_v6  ;;  %v852_v39 = vpop.f32.mrb[42].mxu1 }
 0x173   : > { %v668_v51 = vadd.f32 %v667_v47, %v4569_v0  ;;  %v669_v52 = vpop.f32.mrb[46].mxu0  ;;  %2021 = vmatprep.mubr.bf16.mxu0 %v1076_v36  ;;  %2407 = vmatprep.mubr.bf16.mxu1 %v1076_v36  ;;  %v851_v36 = vadd.f32 %v850_v30, %v4587_v16  ;;  %v989_v47 = vmax.f32 %v849_v29, 0.0  ;;  %v853_v48 = vadd.f32 %v852_v39, %v4583_v13  ;;  %v854_v49 = vpop.f32.mrb[43].mxu1 }
 0x174   : > { %v670_v57 = vadd.f32 %v669_v52, %v4565_v41  ;;  %v671_v58 = vpop.f32.mrb[47].mxu0  ;;  %2022 = vmatmul.mubr.bf16.gmra.mrb[104].mxu0 %v1075_v32  ;;  %2408 = vmatmul.mubr.bf16.gmra.mrb[104].mxu1 %v1075_v32  ;;  %v995_v8 = vmax.f32 %v666_v46, 0.0  ;;  %v855_v53 = vadd.f32 %v854_v49, %v4587_v16  ;;  %v858_v10 = vpop.f32.mrb[44].mxu1 }
 0x175   : > { %v672_v5 = vadd.f32 %v671_v58, %v4569_v0  ;;  %v996_v11 = vmax.f32 %v668_v51, 0.0  ;;  %v990_v52 = vmax.f32 %v851_v36, 0.0  ;;  %v993_v58 = vmax.f32 %v853_v48, 0.0 }
 0x176   : > { %v999_v9 = vmax.f32 %v670_v57, 0.0  ;;  %v994_v2 = vmax.f32 %v855_v53, 0.0  ;;  %v859_v17 = vadd.f32 %v858_v10, %v4583_v13 }
 0x177   : > { %v1000_v12 = vmax.f32 %v672_v5, 0.0  ;;  %v4717_v6 = vpack.c.bf16 %v993_v58, %v989_v47 }
 0x178   : > { %v1079_v18 = vpack.c.bf16 %v999_v9, %v995_v8  ;;  %v4719_v9 = vpack.c.bf16 %v994_v2, %v990_v52  ;;  %v997_v30 = vmax.f32 %v859_v17, 0.0 }
 0x179   : > { %v1080_v22 = vpack.c.bf16 %v1000_v12, %v996_v11  ;;  %v675_v23 = vpop.f32.mrb[48].mxu0 }
 0x17a   : > { %v676_v26 = vadd.f32 %v675_v23, %v4565_v41  ;;  %v677_v27 = vpop.f32.mrb[49].mxu0 }
 0x17b   : > { %v678_v31 = vadd.f32 %v677_v27, %v4569_v0  ;;  %v679_v32 = vpop.f32.mrb[50].mxu0  ;;  %2031 = vmatprep.mubr.bf16.mxu0 %v1080_v22  ;;  %2417 = vmatprep.mubr.bf16.mxu1 %v1080_v22 }
 0x17c   : > { %v680_v44 = vadd.f32 %v679_v32, %v4565_v41  ;;  %v681_v46 = vpop.f32.mrb[51].mxu0  ;;  %2032 = vmatmul.mubr.bf16.gmra.mrb[108].mxu0 %v1079_v18  ;;  %2418 = vmatmul.mubr.bf16.gmra.mrb[108].mxu1 %v1079_v18  ;;  %v1003_v54 = vmax.f32 %v676_v26, 0.0  ;;  %v860_v18 = vpop.f32.mrb[45].mxu1 }
 0x17d   : > { %v682_v51 = vadd.f32 %v681_v46, %v4569_v0  ;;  %v1004_v62 = vmax.f32 %v678_v31, 0.0  ;;  %v861_v25 = vadd.f32 %v860_v18, %v4587_v16  ;;  %v862_v26 = vpop.f32.mrb[46].mxu1 }
 0x17e   : > { %v1007_v57 = vmax.f32 %v680_v44, 0.0  ;;  %v863_v31 = vadd.f32 %v862_v26, %v4583_v13  ;;  %v864_v32 = vpop.f32.mrb[47].mxu1 }
 0x17f   : > { %v1008_v1 = vmax.f32 %v682_v51, 0.0  ;;  %v998_v39 = vmax.f32 %v861_v25, 0.0  ;;  %v865_v44 = vadd.f32 %v864_v32, %v4587_v16 }
 0x180   : > { %v1083_v5 = vpack.c.bf16 %v1007_v57, %v1003_v54  ;;  %v1001_v48 = vmax.f32 %v863_v31, 0.0 }
 0x181   : > { %v1084_v7 = vpack.c.bf16 %v1008_v1, %v1004_v62  ;;  %v685_v8 = vpop.f32.mrb[52].mxu0  ;;  %v1002_v52 = vmax.f32 %v865_v44, 0.0  ;;  %v868_v1 = vpop.f32.mrb[48].mxu1 }
 0x182   : > { %v686_v11 = vadd.f32 %v685_v8, %v4565_v41  ;;  %v687_v12 = vpop.f32.mrb[53].mxu0  ;;  %v4729_v54 = vpack.c.bf16 %v1001_v48, %v997_v30  ;;  %v870_v8 = vpop.f32.mrb[49].mxu1 }
 0x183   : > { %v688_v22 = vadd.f32 %v687_v12, %v4569_v0  ;;  %v689_v23 = vpop.f32.mrb[54].mxu0  ;;  %2041 = vmatprep.mubr.bf16.mxu0 %v1084_v7  ;;  %2427 = vmatprep.mubr.bf16.mxu1 %v1084_v7  ;;  %v4731_v62 = vpack.c.bf16 %v1002_v52, %v998_v39  ;;  %v869_v7 = vadd.f32 %v868_v1, %v4583_v13  ;;  %v872_v17 = vpop.f32.mrb[50].mxu1 }
 0x184   : > { %v690_v27 = vadd.f32 %v689_v23, %v4565_v41  ;;  %v691_v29 = vpop.f32.mrb[55].mxu0  ;;  %2042 = vmatmul.mubr.bf16.gmra.mrb[112].mxu0 %v1083_v5  ;;  %2428 = vmatmul.mubr.bf16.gmra.mrb[112].mxu1 %v1083_v5  ;;  %v1011_v46 = vmax.f32 %v686_v11, 0.0  ;;  %v871_v12 = vadd.f32 %v870_v8, %v4587_v16  ;;  %v873_v25 = vadd.f32 %v872_v17, %v4583_v13  ;;  %v874_v26 = vpop.f32.mrb[51].mxu1 }
 0x185   : > { %v692_v36 = vadd.f32 %v691_v29, %v4569_v0  ;;  %v1012_v49 = vmax.f32 %v688_v22, 0.0  ;;  %v1005_v23 = vmax.f32 %v869_v7, 0.0  ;;  %v875_v30 = vadd.f32 %v874_v26, %v4587_v16 }
 0x186   : > { %v1015_v47 = vmax.f32 %v690_v27, 0.0  ;;  %v1006_v29 = vmax.f32 %v871_v12, 0.0 }
 0x187   : > { %v1016_v51 = vmax.f32 %v692_v36, 0.0  ;;  %v1009_v36 = vmax.f32 %v873_v25, 0.0 }
 0x188   : > { %v1087_v53 = vpack.c.bf16 %v1015_v47, %v1011_v46  ;;  %v1010_v46 = vmax.f32 %v875_v30, 0.0 }
 0x189   : > { %v1088_v57 = vpack.c.bf16 %v1016_v51, %v1012_v49  ;;  %v695_v58 = vpop.f32.mrb[56].mxu0  ;;  %v4741_v48 = vpack.c.bf16 %v1009_v36, %v1005_v23 }
 0x18a   : > { %v696_v2 = vadd.f32 %v695_v58, %v4565_v41  ;;  %v697_v5 = vpop.f32.mrb[57].mxu0  ;;  %v4743_v52 = vpack.c.bf16 %v1010_v46, %v1006_v29 }
 0x18b   : > { %v698_v10 = vadd.f32 %v697_v5, %v4569_v0  ;;  %v699_v11 = vpop.f32.mrb[58].mxu0  ;;  %2051 = vmatprep.mubr.bf16.mxu0 %v1088_v57  ;;  %2437 = vmatprep.mubr.bf16.mxu1 %v1088_v57 }
 0x18c   : > { %v700_v18 = vadd.f32 %v699_v11, %v4565_v41  ;;  %v701_v22 = vpop.f32.mrb[59].mxu0  ;;  %2052 = vmatmul.mubr.bf16.gmra.mrb[116].mxu0 %v1087_v53  ;;  %2438 = vmatmul.mubr.bf16.gmra.mrb[116].mxu1 %v1087_v53  ;;  %v1019_v31 = vmax.f32 %v696_v2, 0.0  ;;  %v878_v53 = vpop.f32.mrb[52].mxu1 }
 0x18d   : > { %v702_v27 = vadd.f32 %v701_v22, %v4569_v0  ;;  %v1020_v39 = vmax.f32 %v698_v10, 0.0  ;;  %v879_v1 = vadd.f32 %v878_v53, %v4583_v13  ;;  %v880_v5 = vpop.f32.mrb[53].mxu1 }
 0x18e   : > { %v1023_v32 = vmax.f32 %v700_v18, 0.0  ;;  %v881_v8 = vadd.f32 %v880_v5, %v4587_v16  ;;  %v882_v10 = vpop.f32.mrb[54].mxu1 }
 0x18f   : > { %v1024_v44 = vmax.f32 %v702_v27, 0.0  ;;  %v1013_v17 = vmax.f32 %v879_v1, 0.0  ;;  %v883_v18 = vadd.f32 %v882_v10, %v4583_v13  ;;  %v884_v22 = vpop.f32.mrb[55].mxu1 }
 0x190   : > { %v1091_v47 = vpack.c.bf16 %v1023_v32, %v1019_v31  ;;  %v1014_v25 = vmax.f32 %v881_v8, 0.0  ;;  %v885_v26 = vadd.f32 %v884_v22, %v4587_v16 }
 0x191   : > { %v1092_v49 = vpack.c.bf16 %v1024_v44, %v1020_v39  ;;  %v705_v51 = vpop.f32.mrb[60].mxu0  ;;  %v1017_v30 = vmax.f32 %v883_v18, 0.0 }
 0x192   : > { %v706_v57 = vadd.f32 %v705_v51, %v4565_v41  ;;  %v707_v58 = vpop.f32.mrb[61].mxu0  ;;  %v1018_v36 = vmax.f32 %v885_v26, 0.0 }
 0x193   : > { %v708_v2 = vadd.f32 %v707_v58, %v4569_v0  ;;  %v709_v7 = vpop.f32.mrb[62].mxu0  ;;  %2061 = vmatprep.mubr.bf16.mxu0 %v1092_v49  ;;  %2447 = vmatprep.mubr.bf16.mxu1 %v1092_v49 }
 0x194   : > { %v710_v11 = vadd.f32 %v709_v7, %v4565_v41  ;;  %v711_v12 = vpop.f32.mrb[63].mxu0  ;;  %2062 = vmatmul.mubr.bf16.gmra.mrb[120].mxu0 %v1091_v47  ;;  %2448 = vmatmul.mubr.bf16.gmra.mrb[120].mxu1 %v1091_v47  ;;  %v1027_v27 = vmax.f32 %v706_v57, 0.0  ;;  %v4753_v41 = vpack.c.bf16 %v1017_v30, %v1013_v17  ;;  %v4755_v46 = vpack.c.bf16 %v1018_v36, %v1014_v25  ;;  %v888_v47 = vpop.f32.mrb[56].mxu1 }
 0x195   : > { %v712_v23 = vadd.f32 %v711_v12, %v4569_v0  ;;  %v1028_v31 = vmax.f32 %v708_v2, 0.0  ;;  %v889_v49 = vadd.f32 %v888_v47, %v4583_v13  ;;  %v890_v51 = vpop.f32.mrb[57].mxu1 }
 0x196   : > { %v1031_v29 = vmax.f32 %v710_v11, 0.0  ;;  %v891_v0 = vadd.f32 %v890_v51, %v4587_v16  ;;  %v892_v53 = vpop.f32.mrb[58].mxu1 }
 0x197   : > { %v1032_v32 = vmax.f32 %v712_v23, 0.0  ;;  %v1021_v57 = vmax.f32 %v889_v49, 0.0  ;;  %v893_v58 = vadd.f32 %v892_v53, %v4583_v13  ;;  %v894_v1 = vpop.f32.mrb[59].mxu1 }
 0x198   : > { %v1095_v39 = vpack.c.bf16 %v1031_v29, %v1027_v27  ;;  %v1022_v5 = vmax.f32 %v891_v0, 0.0  ;;  %v895_v2 = vadd.f32 %v894_v1, %v4587_v16  ;;  %v898_v12 = vpop.f32.mrb[60].mxu1 }
 0x199   : > { %v1096_v44 = vpack.c.bf16 %v1032_v32, %v1028_v31  ;;  %v1025_v7 = vmax.f32 %v893_v58, 0.0  ;;  %v899_v17 = vadd.f32 %v898_v12, %v4583_v13  ;;  %v900_v18 = vpop.f32.mrb[61].mxu1 }
 0x19a   : > { %v1026_v8 = vmax.f32 %v895_v2, 0.0  ;;  %v901_v22 = vadd.f32 %v900_v18, %v4587_v16  ;;  %v902_v23 = vpop.f32.mrb[62].mxu1 }
 0x19b   : > { %2071 = vmatprep.mubr.bf16.mxu0 %v1096_v44  ;;  %2457 = vmatprep.mubr.bf16.mxu1 %v1096_v44  ;;  %v4763_v10 = vpack.c.bf16 %v1025_v7, %v1021_v57  ;;  %v903_v25 = vadd.f32 %v902_v23, %v4583_v13  ;;  %v904_v26 = vpop.f32.mrb[63].mxu1  ;;  %v1227_v13 = vld [vmem:[%s5101_s4] sm:$0xf] }
 0x19c   : > { %2072 = vmatmul.mubr.bf16.gmra.mrb[124].mxu0 %v1095_v39  ;;  %2458 = vmatmul.mubr.bf16.gmra.mrb[124].mxu1 %v1095_v39  ;;  %v4765_v11 = vpack.c.bf16 %v1026_v8, %v1022_v5  ;;  %v1030_v27 = vmax.f32 %v901_v22, 0.0  ;;  %v905_v29 = vadd.f32 %v904_v26, %v4587_v16  ;;  %v4834_v16 = vrot.slane %v1227_v13, %v294_v38 }
 0x19d   : > { %2114 = vmatprep.mubr.bf16.mxu0 %v4599_v61  ;;  %2500 = vmatprep.mubr.bf16.mxu1 %v4599_v61  ;;  %v1029_v61 = vmax.f32 %v899_v17, 0.0  ;;  %v1033_v30 = vmax.f32 %v903_v25, 0.0 }
 0x19e   : > { %v1034_v31 = vmax.f32 %v905_v29, 0.0 }
 0x19f   : > { %v1097_v32 = vpack.c.bf16 %v1033_v30, %v1029_v61 }
 0x1a0   : > { %v1098_v36 = vpack.c.bf16 %v1034_v31, %v1030_v27 }
 0x1a4   : > { %2115 = vmatmul.mubr.bf16.vlgmr.msra.gmra.mrb[64].mxu0 %v4597_v56  ;;  %2501 = vmatmul.mubr.bf16.vlgmr.msra.gmra.mrb[64].mxu1 %v4597_v56  ;;  %v4838_v56 = vrot.slane %v1227_v13, %v302_v63 }
 0x1a5   : > { %2124 = vmatprep.mubr.bf16.mxu0 %v4611_v42  ;;  %2510 = vmatprep.mubr.bf16.mxu1 %v4611_v42  ;;  %v4846_v42 = vrot.slane %v1227_v13, %v306_v3 }
 0x1ac   : > { %2125 = vmatmul.mubr.bf16.gmra.mrb[68].mxu0 %v4609_v33  ;;  %2511 = vmatmul.mubr.bf16.gmra.mrb[68].mxu1 %v4609_v33  ;;  %v4842_v33 = vrot.slane %v1227_v13, %v298_v40 }
 0x1ad   : > { %2134 = vmatprep.mubr.bf16.mxu0 %v4623_v21  ;;  %2520 = vmatprep.mubr.bf16.mxu1 %v4623_v21 }
 0x1b4   : > { %2135 = vmatmul.mubr.bf16.gmra.mrb[72].mxu0 %v4621_v15  ;;  %2521 = vmatmul.mubr.bf16.gmra.mrb[72].mxu1 %v4621_v15 }
 0x1b5   : > { %2144 = vmatprep.mubr.bf16.mxu0 %v4635_v4  ;;  %2530 = vmatprep.mubr.bf16.mxu1 %v4635_v4 }
 0x1bc   : > { %2145 = vmatmul.mubr.bf16.gmra.mrb[76].mxu0 %v4633_v59  ;;  %2531 = vmatmul.mubr.bf16.gmra.mrb[76].mxu1 %v4633_v59 }
 0x1bd   : > { %2154 = vmatprep.mubr.bf16.mxu0 %v4647_v50  ;;  %2540 = vmatprep.mubr.bf16.mxu1 %v4647_v50 }
 0x1c4   : > { %2155 = vmatmul.mubr.bf16.gmra.mrb[80].mxu0 %v4645_v45  ;;  %2541 = vmatmul.mubr.bf16.gmra.mrb[80].mxu1 %v4645_v45 }
 0x1c5   : > { %2164 = vmatprep.mubr.bf16.mxu0 %v4659_v34  ;;  %2550 = vmatprep.mubr.bf16.mxu1 %v4659_v34 }
 0x1cc   : > { %2165 = vmatmul.mubr.bf16.gmra.mrb[84].mxu0 %v4657_v28  ;;  %2551 = vmatmul.mubr.bf16.gmra.mrb[84].mxu1 %v4657_v28 }
 0x1cd   : > { %2174 = vmatprep.mubr.bf16.mxu0 %v4671_v19  ;;  %2560 = vmatprep.mubr.bf16.mxu1 %v4671_v19 }
 0x1d4   : > { %2175 = vmatmul.mubr.bf16.gmra.mrb[88].mxu0 %v4669_v14  ;;  %2561 = vmatmul.mubr.bf16.gmra.mrb[88].mxu1 %v4669_v14 }
 0x1d5   : > { %2184 = vmatprep.mubr.bf16.mxu0 %v4683_v60  ;;  %2570 = vmatprep.mubr.bf16.mxu1 %v4683_v60 }
 0x1dc   : > { %2185 = vmatmul.mubr.bf16.gmra.mrb[92].mxu0 %v4681_v55  ;;  %2571 = vmatmul.mubr.bf16.gmra.mrb[92].mxu1 %v4681_v55 }
 0x1dd   : > { %2194 = vmatprep.mubr.bf16.mxu0 %v4695_v43  ;;  %2580 = vmatprep.mubr.bf16.mxu1 %v4695_v43 }
 0x1e4   : > { %2195 = vmatmul.mubr.bf16.gmra.mrb[96].mxu0 %v4693_v35  ;;  %2581 = vmatmul.mubr.bf16.gmra.mrb[96].mxu1 %v4693_v35 }
 0x1e5   : > { %2204 = vmatprep.mubr.bf16.mxu0 %v4707_v24  ;;  %2590 = vmatprep.mubr.bf16.mxu1 %v4707_v24 }
 0x1ec   : > { %2205 = vmatmul.mubr.bf16.gmra.mrb[100].mxu0 %v4705_v20  ;;  %2591 = vmatmul.mubr.bf16.gmra.mrb[100].mxu1 %v4705_v20 }
 0x1ed   : > { %2214 = vmatprep.mubr.bf16.mxu0 %v4719_v9  ;;  %2600 = vmatprep.mubr.bf16.mxu1 %v4719_v9 }
 0x1f4   : > { %2215 = vmatmul.mubr.bf16.gmra.mrb[104].mxu0 %v4717_v6  ;;  %2601 = vmatmul.mubr.bf16.gmra.mrb[104].mxu1 %v4717_v6 }
 0x1f5   : > { %2224 = vmatprep.mubr.bf16.mxu0 %v4731_v62  ;;  %2610 = vmatprep.mubr.bf16.mxu1 %v4731_v62 }
 0x1fc   : > { %2225 = vmatmul.mubr.bf16.gmra.mrb[108].mxu0 %v4729_v54  ;;  %2611 = vmatmul.mubr.bf16.gmra.mrb[108].mxu1 %v4729_v54 }
 0x1fd   : > { %2234 = vmatprep.mubr.bf16.mxu0 %v4743_v52  ;;  %2620 = vmatprep.mubr.bf16.mxu1 %v4743_v52 }
 0x204   : > { %2235 = vmatmul.mubr.bf16.gmra.mrb[112].mxu0 %v4741_v48  ;;  %2621 = vmatmul.mubr.bf16.gmra.mrb[112].mxu1 %v4741_v48 }
 0x205   : > { %2244 = vmatprep.mubr.bf16.mxu0 %v4755_v46  ;;  %2630 = vmatprep.mubr.bf16.mxu1 %v4755_v46 }
 0x20c   : > { %2245 = vmatmul.mubr.bf16.gmra.mrb[116].mxu0 %v4753_v41  ;;  %2631 = vmatmul.mubr.bf16.gmra.mrb[116].mxu1 %v4753_v41 }
 0x20d   : > { %2254 = vmatprep.mubr.bf16.mxu0 %v4765_v11  ;;  %2640 = vmatprep.mubr.bf16.mxu1 %v4765_v11 }
 0x214   : > { %2255 = vmatmul.mubr.bf16.gmra.mrb[120].mxu0 %v4763_v10  ;;  %2641 = vmatmul.mubr.bf16.gmra.mrb[120].mxu1 %v4763_v10 }
 0x215   : > { %2264 = vmatprep.mubr.bf16.mxu0 %v1098_v36  ;;  %2650 = vmatprep.mubr.bf16.mxu1 %v1098_v36 }
 0x21c   : > { %2265 = vmatmul.mubr.bf16.gmra.mrb[124].mxu0 %v1097_v32  ;;  %2651 = vmatmul.mubr.bf16.gmra.mrb[124].mxu1 %v1097_v32 }
 0x277   : > { %v2116_v15 = vpop.f32.mrb[64].mxu0  ;;  %v2502_v21 = vpop.f32.mrb[64].mxu1 }
 0x278   : > { %v3663_v59 = vadd.f32 %v2116_v15, %v4834_v16  ;;  %v3727_v38 = vadd.f32 %v2502_v21, %v4838_v56  ;;  %v2118_v4 = vpop.f32.mrb[65].mxu0  ;;  %v2504_v45 = vpop.f32.mrb[65].mxu1 }
 0x279   : > { %v3664_v63 = vadd.f32 %v2118_v4, %v4842_v33  ;;  %v3728_v40 = vadd.f32 %v2504_v45, %v4846_v42  ;;  %v2120_v50 = vpop.f32.mrb[66].mxu0  ;;  %v2506_v28 = vpop.f32.mrb[66].mxu1 }
 0x27a   : > { %v2661_v37 = vmax.f32 %v3663_v59, 0.0  ;;  %v2663_v3 = vmax.f32 %v3727_v38, 0.0  ;;  %v3665_v34 = vadd.f32 %v2120_v50, %v4834_v16  ;;  %v3729_v14 = vadd.f32 %v2506_v28, %v4838_v56  ;;  %v2122_v19 = vpop.f32.mrb[67].mxu0  ;;  %v2508_v55 = vpop.f32.mrb[67].mxu1 }
 0x27b   : > { %v2662_v60 = vmax.f32 %v3664_v63, 0.0  ;;  %v2664_v35 = vmax.f32 %v3728_v40, 0.0  ;;  %v3666_v43 = vadd.f32 %v2122_v19, %v4842_v33  ;;  %v3730_v20 = vadd.f32 %v2508_v55, %v4846_v42 }
 0x27c   : > { %v2665_v24 = vmax.f32 %v3665_v34, 0.0  ;;  %v2667_v6 = vmax.f32 %v3729_v14, 0.0 }
 0x27d   : > { %v3597_v9 = vpack.c.bf16 %v2662_v60, %v2661_v37  ;;  %v3598_v54 = vpack.c.bf16 %v2664_v35, %v2663_v3  ;;  %v2666_v62 = vmax.f32 %v3666_v43, 0.0  ;;  %v2668_v48 = vmax.f32 %v3730_v20, 0.0 }
 0x27f   : > { %3173 = vst [vmem:[%s4859_s16] sm:$0xff] %v3597_v9  ;;  %3174 = vst [vmem:[%s4859_s16 + $0x8] sm:$0xff] %v3598_v54  ;;  %v3599_v52 = vpack.c.bf16 %v2666_v62, %v2665_v24  ;;  %v3600_v39 = vpack.c.bf16 %v2668_v48, %v2667_v6  ;;  %v2126_v41 = vpop.f32.mrb[68].mxu0  ;;  %v2512_v44 = vpop.f32.mrb[68].mxu1 }
 0x280   : > { %v3667_v46 = vadd.f32 %v2126_v41, %v4834_v16  ;;  %v3731_v47 = vadd.f32 %v2512_v44, %v4838_v56  ;;  %v2128_v49 = vpop.f32.mrb[69].mxu0  ;;  %v2514_v51 = vpop.f32.mrb[69].mxu1 }
 0x281   : > { %3175 = vst [vmem:[%s4859_s16 + $0x10] sm:$0xff] %v3599_v52  ;;  %3176 = vst [vmem:[%s4859_s16 + $0x18] sm:$0xff] %v3600_v39  ;;  %v3668_v0 = vadd.f32 %v2128_v49, %v4842_v33  ;;  %v3732_v53 = vadd.f32 %v2514_v51, %v4846_v42  ;;  %v2130_v57 = vpop.f32.mrb[70].mxu0  ;;  %v2516_v58 = vpop.f32.mrb[70].mxu1 }
 0x282   : > { %v2669_v1 = vmax.f32 %v3667_v46, 0.0  ;;  %v2671_v5 = vmax.f32 %v3731_v47, 0.0  ;;  %v3669_v2 = vadd.f32 %v2130_v57, %v4834_v16  ;;  %v3733_v7 = vadd.f32 %v2516_v58, %v4838_v56  ;;  %v2132_v8 = vpop.f32.mrb[71].mxu0  ;;  %v2518_v10 = vpop.f32.mrb[71].mxu1 }
 0x283   : > { %v2670_v11 = vmax.f32 %v3668_v0, 0.0  ;;  %v2672_v12 = vmax.f32 %v3732_v53, 0.0  ;;  %v3670_v17 = vadd.f32 %v2132_v8, %v4842_v33  ;;  %v3734_v18 = vadd.f32 %v2518_v10, %v4846_v42 }
 0x284   : > { %v2673_v22 = vmax.f32 %v3669_v2, 0.0  ;;  %v2675_v23 = vmax.f32 %v3733_v7, 0.0 }
 0x285   : > { %v3601_v61 = vpack.c.bf16 %v2670_v11, %v2669_v1  ;;  %v3602_v25 = vpack.c.bf16 %v2672_v12, %v2671_v5  ;;  %v2674_v26 = vmax.f32 %v3670_v17, 0.0  ;;  %v2676_v27 = vmax.f32 %v3734_v18, 0.0 }
 0x287   : > { %3177 = vst [vmem:[%s4859_s16 + $0x20] sm:$0xff] %v3601_v61  ;;  %3178 = vst [vmem:[%s4859_s16 + $0x28] sm:$0xff] %v3602_v25  ;;  %v3603_v29 = vpack.c.bf16 %v2674_v26, %v2673_v22  ;;  %v3604_v30 = vpack.c.bf16 %v2676_v27, %v2675_v23  ;;  %v2136_v31 = vpop.f32.mrb[72].mxu0  ;;  %v2522_v32 = vpop.f32.mrb[72].mxu1 }
 0x288   : > { %v3671_v36 = vadd.f32 %v2136_v31, %v4834_v16  ;;  %v3735_v13 = vadd.f32 %v2522_v32, %v4838_v56  ;;  %v2138_v15 = vpop.f32.mrb[73].mxu0  ;;  %v2524_v21 = vpop.f32.mrb[73].mxu1 }
 0x289   : > { %3179 = vst [vmem:[%s4859_s16 + $0x30] sm:$0xff] %v3603_v29  ;;  %3180 = vst [vmem:[%s4859_s16 + $0x38] sm:$0xff] %v3604_v30  ;;  %v3672_v59 = vadd.f32 %v2138_v15, %v4842_v33  ;;  %v3736_v38 = vadd.f32 %v2524_v21, %v4846_v42  ;;  %v2140_v4 = vpop.f32.mrb[74].mxu0  ;;  %v2526_v45 = vpop.f32.mrb[74].mxu1 }
 0x28a   : > { %v2677_v63 = vmax.f32 %v3671_v36, 0.0  ;;  %v2679_v40 = vmax.f32 %v3735_v13, 0.0  ;;  %v3673_v50 = vadd.f32 %v2140_v4, %v4834_v16  ;;  %v3737_v28 = vadd.f32 %v2526_v45, %v4838_v56  ;;  %v2142_v37 = vpop.f32.mrb[75].mxu0  ;;  %v2528_v3 = vpop.f32.mrb[75].mxu1 }
 0x28b   : > { %v2678_v34 = vmax.f32 %v3672_v59, 0.0  ;;  %v2680_v14 = vmax.f32 %v3736_v38, 0.0  ;;  %v3674_v19 = vadd.f32 %v2142_v37, %v4842_v33  ;;  %v3738_v55 = vadd.f32 %v2528_v3, %v4846_v42 }
 0x28c   : > { %v2681_v60 = vmax.f32 %v3673_v50, 0.0  ;;  %v2683_v35 = vmax.f32 %v3737_v28, 0.0 }
 0x28d   : > { %v3605_v43 = vpack.c.bf16 %v2678_v34, %v2677_v63  ;;  %v3606_v20 = vpack.c.bf16 %v2680_v14, %v2679_v40  ;;  %v2682_v24 = vmax.f32 %v3674_v19, 0.0  ;;  %v2684_v6 = vmax.f32 %v3738_v55, 0.0 }
 0x28f   : > { %3181 = vst [vmem:[%s4859_s16 + $0x40] sm:$0xff] %v3605_v43  ;;  %3182 = vst [vmem:[%s4859_s16 + $0x48] sm:$0xff] %v3606_v20  ;;  %v3607_v9 = vpack.c.bf16 %v2682_v24, %v2681_v60  ;;  %v3608_v54 = vpack.c.bf16 %v2684_v6, %v2683_v35  ;;  %v2146_v62 = vpop.f32.mrb[76].mxu0  ;;  %v2532_v48 = vpop.f32.mrb[76].mxu1 }
 0x290   : > { %v3675_v52 = vadd.f32 %v2146_v62, %v4834_v16  ;;  %v3739_v39 = vadd.f32 %v2532_v48, %v4838_v56  ;;  %v2148_v41 = vpop.f32.mrb[77].mxu0  ;;  %v2534_v44 = vpop.f32.mrb[77].mxu1 }
 0x291   : > { %3183 = vst [vmem:[%s4859_s16 + $0x50] sm:$0xff] %v3607_v9  ;;  %3184 = vst [vmem:[%s4859_s16 + $0x58] sm:$0xff] %v3608_v54  ;;  %v3676_v46 = vadd.f32 %v2148_v41, %v4842_v33  ;;  %v3740_v47 = vadd.f32 %v2534_v44, %v4846_v42  ;;  %v2150_v49 = vpop.f32.mrb[78].mxu0  ;;  %v2536_v51 = vpop.f32.mrb[78].mxu1 }
 0x292   : > { %v2685_v0 = vmax.f32 %v3675_v52, 0.0  ;;  %v2687_v53 = vmax.f32 %v3739_v39, 0.0  ;;  %v3677_v57 = vadd.f32 %v2150_v49, %v4834_v16  ;;  %v3741_v58 = vadd.f32 %v2536_v51, %v4838_v56  ;;  %v2152_v1 = vpop.f32.mrb[79].mxu0  ;;  %v2538_v5 = vpop.f32.mrb[79].mxu1 }
 0x293   : > { %v2686_v2 = vmax.f32 %v3676_v46, 0.0  ;;  %v2688_v7 = vmax.f32 %v3740_v47, 0.0  ;;  %v3678_v8 = vadd.f32 %v2152_v1, %v4842_v33  ;;  %v3742_v10 = vadd.f32 %v2538_v5, %v4846_v42 }
 0x294   : > { %v2689_v11 = vmax.f32 %v3677_v57, 0.0  ;;  %v2691_v12 = vmax.f32 %v3741_v58, 0.0 }
 0x295   : > { %v3609_v17 = vpack.c.bf16 %v2686_v2, %v2685_v0  ;;  %v3610_v18 = vpack.c.bf16 %v2688_v7, %v2687_v53  ;;  %v2690_v22 = vmax.f32 %v3678_v8, 0.0  ;;  %v2692_v23 = vmax.f32 %v3742_v10, 0.0 }
 0x297   : > { %3185 = vst [vmem:[%s4859_s16 + $0x60] sm:$0xff] %v3609_v17  ;;  %3186 = vst [vmem:[%s4859_s16 + $0x68] sm:$0xff] %v3610_v18  ;;  %v3611_v61 = vpack.c.bf16 %v2690_v22, %v2689_v11  ;;  %v3612_v25 = vpack.c.bf16 %v2692_v23, %v2691_v12  ;;  %v2156_v26 = vpop.f32.mrb[80].mxu0  ;;  %v2542_v27 = vpop.f32.mrb[80].mxu1 }
 0x298   : > { %v3679_v29 = vadd.f32 %v2156_v26, %v4834_v16  ;;  %v3743_v30 = vadd.f32 %v2542_v27, %v4838_v56  ;;  %v2158_v31 = vpop.f32.mrb[81].mxu0  ;;  %v2544_v32 = vpop.f32.mrb[81].mxu1 }
 0x299   : > { %3187 = vst [vmem:[%s4859_s16 + $0x70] sm:$0xff] %v3611_v61  ;;  %3188 = vst [vmem:[%s4859_s16 + $0x78] sm:$0xff] %v3612_v25  ;;  %v3680_v36 = vadd.f32 %v2158_v31, %v4842_v33  ;;  %v3744_v13 = vadd.f32 %v2544_v32, %v4846_v42  ;;  %v2160_v15 = vpop.f32.mrb[82].mxu0  ;;  %v2546_v21 = vpop.f32.mrb[82].mxu1 }
 0x29a   : > { %v2693_v59 = vmax.f32 %v3679_v29, 0.0  ;;  %v2695_v38 = vmax.f32 %v3743_v30, 0.0  ;;  %v3681_v4 = vadd.f32 %v2160_v15, %v4834_v16  ;;  %v3745_v45 = vadd.f32 %v2546_v21, %v4838_v56  ;;  %v2162_v63 = vpop.f32.mrb[83].mxu0  ;;  %v2548_v40 = vpop.f32.mrb[83].mxu1 }
 0x29b   : > { %v2694_v50 = vmax.f32 %v3680_v36, 0.0  ;;  %v2696_v28 = vmax.f32 %v3744_v13, 0.0  ;;  %v3682_v37 = vadd.f32 %v2162_v63, %v4842_v33  ;;  %v3746_v3 = vadd.f32 %v2548_v40, %v4846_v42 }
 0x29c   : > { %v2697_v34 = vmax.f32 %v3681_v4, 0.0  ;;  %v2699_v14 = vmax.f32 %v3745_v45, 0.0 }
 0x29d   : > { %v3613_v19 = vpack.c.bf16 %v2694_v50, %v2693_v59  ;;  %v3614_v55 = vpack.c.bf16 %v2696_v28, %v2695_v38  ;;  %v2698_v60 = vmax.f32 %v3682_v37, 0.0  ;;  %v2700_v35 = vmax.f32 %v3746_v3, 0.0 }
 0x29f   : > { %3189 = vst [vmem:[%s4859_s16 + $0x80] sm:$0xff] %v3613_v19  ;;  %3190 = vst [vmem:[%s4859_s16 + $0x88] sm:$0xff] %v3614_v55  ;;  %v3615_v43 = vpack.c.bf16 %v2698_v60, %v2697_v34  ;;  %v3616_v20 = vpack.c.bf16 %v2700_v35, %v2699_v14  ;;  %v2166_v24 = vpop.f32.mrb[84].mxu0  ;;  %v2552_v6 = vpop.f32.mrb[84].mxu1 }
 0x2a0   : > { %v3683_v9 = vadd.f32 %v2166_v24, %v4834_v16  ;;  %v3747_v54 = vadd.f32 %v2552_v6, %v4838_v56  ;;  %v2168_v62 = vpop.f32.mrb[85].mxu0  ;;  %v2554_v48 = vpop.f32.mrb[85].mxu1 }
 0x2a1   : > { %3191 = vst [vmem:[%s4859_s16 + $0x90] sm:$0xff] %v3615_v43  ;;  %3192 = vst [vmem:[%s4859_s16 + $0x98] sm:$0xff] %v3616_v20  ;;  %v3684_v52 = vadd.f32 %v2168_v62, %v4842_v33  ;;  %v3748_v39 = vadd.f32 %v2554_v48, %v4846_v42  ;;  %v2170_v41 = vpop.f32.mrb[86].mxu0  ;;  %v2556_v44 = vpop.f32.mrb[86].mxu1 }
 0x2a2   : > { %v2701_v46 = vmax.f32 %v3683_v9, 0.0  ;;  %v2703_v47 = vmax.f32 %v3747_v54, 0.0  ;;  %v3685_v49 = vadd.f32 %v2170_v41, %v4834_v16  ;;  %v3749_v51 = vadd.f32 %v2556_v44, %v4838_v56  ;;  %v2172_v0 = vpop.f32.mrb[87].mxu0  ;;  %v2558_v53 = vpop.f32.mrb[87].mxu1 }
 0x2a3   : > { %v2702_v57 = vmax.f32 %v3684_v52, 0.0  ;;  %v2704_v58 = vmax.f32 %v3748_v39, 0.0  ;;  %v3686_v1 = vadd.f32 %v2172_v0, %v4842_v33  ;;  %v3750_v5 = vadd.f32 %v2558_v53, %v4846_v42 }
 0x2a4   : > { %v2705_v2 = vmax.f32 %v3685_v49, 0.0  ;;  %v2707_v7 = vmax.f32 %v3749_v51, 0.0 }
 0x2a5   : > { %v3617_v8 = vpack.c.bf16 %v2702_v57, %v2701_v46  ;;  %v3618_v10 = vpack.c.bf16 %v2704_v58, %v2703_v47  ;;  %v2706_v11 = vmax.f32 %v3686_v1, 0.0  ;;  %v2708_v12 = vmax.f32 %v3750_v5, 0.0 }
 0x2a7   : > { %3193 = vst [vmem:[%s4859_s16 + $0xa0] sm:$0xff] %v3617_v8  ;;  %3194 = vst [vmem:[%s4859_s16 + $0xa8] sm:$0xff] %v3618_v10  ;;  %v3619_v17 = vpack.c.bf16 %v2706_v11, %v2705_v2  ;;  %v3620_v18 = vpack.c.bf16 %v2708_v12, %v2707_v7  ;;  %v2176_v22 = vpop.f32.mrb[88].mxu0  ;;  %v2562_v23 = vpop.f32.mrb[88].mxu1 }
 0x2a8   : > { %v3687_v61 = vadd.f32 %v2176_v22, %v4834_v16  ;;  %v3751_v25 = vadd.f32 %v2562_v23, %v4838_v56  ;;  %v2178_v26 = vpop.f32.mrb[89].mxu0  ;;  %v2564_v27 = vpop.f32.mrb[89].mxu1 }
 0x2a9   : > { %3195 = vst [vmem:[%s4859_s16 + $0xb0] sm:$0xff] %v3619_v17  ;;  %3196 = vst [vmem:[%s4859_s16 + $0xb8] sm:$0xff] %v3620_v18  ;;  %v3688_v29 = vadd.f32 %v2178_v26, %v4842_v33  ;;  %v3752_v30 = vadd.f32 %v2564_v27, %v4846_v42  ;;  %v2180_v31 = vpop.f32.mrb[90].mxu0  ;;  %v2566_v32 = vpop.f32.mrb[90].mxu1 }
 0x2aa   : > { %v2709_v36 = vmax.f32 %v3687_v61, 0.0  ;;  %v2711_v13 = vmax.f32 %v3751_v25, 0.0  ;;  %v3689_v15 = vadd.f32 %v2180_v31, %v4834_v16  ;;  %v3753_v21 = vadd.f32 %v2566_v32, %v4838_v56  ;;  %v2182_v59 = vpop.f32.mrb[91].mxu0  ;;  %v2568_v38 = vpop.f32.mrb[91].mxu1 }
 0x2ab   : > { %v2710_v4 = vmax.f32 %v3688_v29, 0.0  ;;  %v2712_v45 = vmax.f32 %v3752_v30, 0.0  ;;  %v3690_v63 = vadd.f32 %v2182_v59, %v4842_v33  ;;  %v3754_v40 = vadd.f32 %v2568_v38, %v4846_v42 }
 0x2ac   : > { %v2713_v50 = vmax.f32 %v3689_v15, 0.0  ;;  %v2715_v28 = vmax.f32 %v3753_v21, 0.0 }
 0x2ad   : > { %v3621_v37 = vpack.c.bf16 %v2710_v4, %v2709_v36  ;;  %v3622_v3 = vpack.c.bf16 %v2712_v45, %v2711_v13  ;;  %v2714_v34 = vmax.f32 %v3690_v63, 0.0  ;;  %v2716_v14 = vmax.f32 %v3754_v40, 0.0 }
 0x2af   : > { %3197 = vst [vmem:[%s4859_s16 + $0xc0] sm:$0xff] %v3621_v37  ;;  %3198 = vst [vmem:[%s4859_s16 + $0xc8] sm:$0xff] %v3622_v3  ;;  %v3623_v19 = vpack.c.bf16 %v2714_v34, %v2713_v50  ;;  %v3624_v55 = vpack.c.bf16 %v2716_v14, %v2715_v28  ;;  %v2186_v60 = vpop.f32.mrb[92].mxu0  ;;  %v2572_v35 = vpop.f32.mrb[92].mxu1 }
 0x2b0   : > { %v3691_v43 = vadd.f32 %v2186_v60, %v4834_v16  ;;  %v3755_v20 = vadd.f32 %v2572_v35, %v4838_v56  ;;  %v2188_v24 = vpop.f32.mrb[93].mxu0  ;;  %v2574_v6 = vpop.f32.mrb[93].mxu1 }
 0x2b1   : > { %3199 = vst [vmem:[%s4859_s16 + $0xd0] sm:$0xff] %v3623_v19  ;;  %3200 = vst [vmem:[%s4859_s16 + $0xd8] sm:$0xff] %v3624_v55  ;;  %v3692_v9 = vadd.f32 %v2188_v24, %v4842_v33  ;;  %v3756_v54 = vadd.f32 %v2574_v6, %v4846_v42  ;;  %v2190_v62 = vpop.f32.mrb[94].mxu0  ;;  %v2576_v48 = vpop.f32.mrb[94].mxu1 }
 0x2b2   : > { %v2717_v52 = vmax.f32 %v3691_v43, 0.0  ;;  %v2719_v39 = vmax.f32 %v3755_v20, 0.0  ;;  %v3693_v41 = vadd.f32 %v2190_v62, %v4834_v16  ;;  %v3757_v44 = vadd.f32 %v2576_v48, %v4838_v56  ;;  %v2192_v46 = vpop.f32.mrb[95].mxu0  ;;  %v2578_v47 = vpop.f32.mrb[95].mxu1 }
 0x2b3   : > { %v2718_v49 = vmax.f32 %v3692_v9, 0.0  ;;  %v2720_v51 = vmax.f32 %v3756_v54, 0.0  ;;  %v3694_v0 = vadd.f32 %v2192_v46, %v4842_v33  ;;  %v3758_v53 = vadd.f32 %v2578_v47, %v4846_v42 }
 0x2b4   : > { %v2721_v57 = vmax.f32 %v3693_v41, 0.0  ;;  %v2723_v58 = vmax.f32 %v3757_v44, 0.0 }
 0x2b5   : > { %v3625_v1 = vpack.c.bf16 %v2718_v49, %v2717_v52  ;;  %v3626_v5 = vpack.c.bf16 %v2720_v51, %v2719_v39  ;;  %v2722_v2 = vmax.f32 %v3694_v0, 0.0  ;;  %v2724_v7 = vmax.f32 %v3758_v53, 0.0 }
 0x2b7   : > { %3201 = vst [vmem:[%s4859_s16 + $0xe0] sm:$0xff] %v3625_v1  ;;  %3202 = vst [vmem:[%s4859_s16 + $0xe8] sm:$0xff] %v3626_v5  ;;  %v3627_v8 = vpack.c.bf16 %v2722_v2, %v2721_v57  ;;  %v3628_v10 = vpack.c.bf16 %v2724_v7, %v2723_v58  ;;  %v2196_v11 = vpop.f32.mrb[96].mxu0  ;;  %v2582_v12 = vpop.f32.mrb[96].mxu1 }
 0x2b8   : > { %v3695_v17 = vadd.f32 %v2196_v11, %v4834_v16  ;;  %v3759_v18 = vadd.f32 %v2582_v12, %v4838_v56  ;;  %v2198_v22 = vpop.f32.mrb[97].mxu0  ;;  %v2584_v23 = vpop.f32.mrb[97].mxu1 }
 0x2b9   : > { %3203 = vst [vmem:[%s4859_s16 + $0xf0] sm:$0xff] %v3627_v8  ;;  %3204 = vst [vmem:[%s4859_s16 + $0xf8] sm:$0xff] %v3628_v10  ;;  %v3696_v61 = vadd.f32 %v2198_v22, %v4842_v33  ;;  %v3760_v25 = vadd.f32 %v2584_v23, %v4846_v42  ;;  %v2200_v26 = vpop.f32.mrb[98].mxu0  ;;  %v2586_v27 = vpop.f32.mrb[98].mxu1 }
 0x2ba   : > { %v2725_v29 = vmax.f32 %v3695_v17, 0.0  ;;  %v2727_v30 = vmax.f32 %v3759_v18, 0.0  ;;  %v3697_v31 = vadd.f32 %v2200_v26, %v4834_v16  ;;  %v3761_v32 = vadd.f32 %v2586_v27, %v4838_v56  ;;  %v2202_v36 = vpop.f32.mrb[99].mxu0  ;;  %v2588_v13 = vpop.f32.mrb[99].mxu1 }
 0x2bb   : > { %v2726_v15 = vmax.f32 %v3696_v61, 0.0  ;;  %v2728_v21 = vmax.f32 %v3760_v25, 0.0  ;;  %v3698_v59 = vadd.f32 %v2202_v36, %v4842_v33  ;;  %v3762_v38 = vadd.f32 %v2588_v13, %v4846_v42 }
 0x2bc   : > { %v2729_v4 = vmax.f32 %v3697_v31, 0.0  ;;  %v2731_v45 = vmax.f32 %v3761_v32, 0.0 }
 0x2bd   : > { %v3629_v63 = vpack.c.bf16 %v2726_v15, %v2725_v29  ;;  %v3630_v40 = vpack.c.bf16 %v2728_v21, %v2727_v30  ;;  %v2730_v50 = vmax.f32 %v3698_v59, 0.0  ;;  %v2732_v28 = vmax.f32 %v3762_v38, 0.0 }
 0x2bf   : > { %3205 = vst [vmem:[%s4859_s16 + $0x100] sm:$0xff] %v3629_v63  ;;  %3206 = vst [vmem:[%s4859_s16 + $0x108] sm:$0xff] %v3630_v40  ;;  %v3631_v37 = vpack.c.bf16 %v2730_v50, %v2729_v4  ;;  %v3632_v3 = vpack.c.bf16 %v2732_v28, %v2731_v45  ;;  %v2206_v34 = vpop.f32.mrb[100].mxu0  ;;  %v2592_v14 = vpop.f32.mrb[100].mxu1 }
 0x2c0   : > { %v3699_v19 = vadd.f32 %v2206_v34, %v4834_v16  ;;  %v3763_v55 = vadd.f32 %v2592_v14, %v4838_v56  ;;  %v2208_v60 = vpop.f32.mrb[101].mxu0  ;;  %v2594_v35 = vpop.f32.mrb[101].mxu1 }
 0x2c1   : > { %3207 = vst [vmem:[%s4859_s16 + $0x110] sm:$0xff] %v3631_v37  ;;  %3208 = vst [vmem:[%s4859_s16 + $0x118] sm:$0xff] %v3632_v3  ;;  %v3700_v43 = vadd.f32 %v2208_v60, %v4842_v33  ;;  %v3764_v20 = vadd.f32 %v2594_v35, %v4846_v42  ;;  %v2210_v24 = vpop.f32.mrb[102].mxu0  ;;  %v2596_v6 = vpop.f32.mrb[102].mxu1 }
 0x2c2   : > { %v2733_v9 = vmax.f32 %v3699_v19, 0.0  ;;  %v2735_v54 = vmax.f32 %v3763_v55, 0.0  ;;  %v3701_v62 = vadd.f32 %v2210_v24, %v4834_v16  ;;  %v3765_v48 = vadd.f32 %v2596_v6, %v4838_v56  ;;  %v2212_v52 = vpop.f32.mrb[103].mxu0  ;;  %v2598_v39 = vpop.f32.mrb[103].mxu1 }
 0x2c3   : > { %v2734_v41 = vmax.f32 %v3700_v43, 0.0  ;;  %v2736_v44 = vmax.f32 %v3764_v20, 0.0  ;;  %v3702_v46 = vadd.f32 %v2212_v52, %v4842_v33  ;;  %v3766_v47 = vadd.f32 %v2598_v39, %v4846_v42 }
 0x2c4   : > { %v2737_v49 = vmax.f32 %v3701_v62, 0.0  ;;  %v2739_v51 = vmax.f32 %v3765_v48, 0.0 }
 0x2c5   : > { %v3633_v0 = vpack.c.bf16 %v2734_v41, %v2733_v9  ;;  %v3634_v53 = vpack.c.bf16 %v2736_v44, %v2735_v54  ;;  %v2738_v57 = vmax.f32 %v3702_v46, 0.0  ;;  %v2740_v58 = vmax.f32 %v3766_v47, 0.0 }
 0x2c7   : > { %3209 = vst [vmem:[%s4859_s16 + $0x120] sm:$0xff] %v3633_v0  ;;  %3210 = vst [vmem:[%s4859_s16 + $0x128] sm:$0xff] %v3634_v53  ;;  %v3635_v1 = vpack.c.bf16 %v2738_v57, %v2737_v49  ;;  %v3636_v5 = vpack.c.bf16 %v2740_v58, %v2739_v51  ;;  %v2216_v2 = vpop.f32.mrb[104].mxu0  ;;  %v2602_v7 = vpop.f32.mrb[104].mxu1 }
 0x2c8   : > { %v3703_v8 = vadd.f32 %v2216_v2, %v4834_v16  ;;  %v3767_v10 = vadd.f32 %v2602_v7, %v4838_v56  ;;  %v2218_v11 = vpop.f32.mrb[105].mxu0  ;;  %v2604_v12 = vpop.f32.mrb[105].mxu1 }
 0x2c9   : > { %3211 = vst [vmem:[%s4859_s16 + $0x130] sm:$0xff] %v3635_v1  ;;  %3212 = vst [vmem:[%s4859_s16 + $0x138] sm:$0xff] %v3636_v5  ;;  %v3704_v17 = vadd.f32 %v2218_v11, %v4842_v33  ;;  %v3768_v18 = vadd.f32 %v2604_v12, %v4846_v42  ;;  %v2220_v22 = vpop.f32.mrb[106].mxu0  ;;  %v2606_v23 = vpop.f32.mrb[106].mxu1 }
 0x2ca   : > { %v2741_v61 = vmax.f32 %v3703_v8, 0.0  ;;  %v2743_v25 = vmax.f32 %v3767_v10, 0.0  ;;  %v3705_v26 = vadd.f32 %v2220_v22, %v4834_v16  ;;  %v3769_v27 = vadd.f32 %v2606_v23, %v4838_v56  ;;  %v2222_v29 = vpop.f32.mrb[107].mxu0  ;;  %v2608_v30 = vpop.f32.mrb[107].mxu1 }
 0x2cb   : > { %v2742_v31 = vmax.f32 %v3704_v17, 0.0  ;;  %v2744_v32 = vmax.f32 %v3768_v18, 0.0  ;;  %v3706_v36 = vadd.f32 %v2222_v29, %v4842_v33  ;;  %v3770_v13 = vadd.f32 %v2608_v30, %v4846_v42 }
 0x2cc   : > { %v2745_v15 = vmax.f32 %v3705_v26, 0.0  ;;  %v2747_v21 = vmax.f32 %v3769_v27, 0.0 }
 0x2cd   : > { %v3637_v59 = vpack.c.bf16 %v2742_v31, %v2741_v61  ;;  %v3638_v38 = vpack.c.bf16 %v2744_v32, %v2743_v25  ;;  %v2746_v4 = vmax.f32 %v3706_v36, 0.0  ;;  %v2748_v45 = vmax.f32 %v3770_v13, 0.0 }
 0x2cf   : > { %3213 = vst [vmem:[%s4859_s16 + $0x140] sm:$0xff] %v3637_v59  ;;  %3214 = vst [vmem:[%s4859_s16 + $0x148] sm:$0xff] %v3638_v38  ;;  %v3639_v63 = vpack.c.bf16 %v2746_v4, %v2745_v15  ;;  %v3640_v40 = vpack.c.bf16 %v2748_v45, %v2747_v21  ;;  %v2226_v50 = vpop.f32.mrb[108].mxu0  ;;  %v2612_v28 = vpop.f32.mrb[108].mxu1 }
 0x2d0   : > { %v3707_v37 = vadd.f32 %v2226_v50, %v4834_v16  ;;  %v3771_v3 = vadd.f32 %v2612_v28, %v4838_v56  ;;  %v2228_v34 = vpop.f32.mrb[109].mxu0  ;;  %v2614_v14 = vpop.f32.mrb[109].mxu1 }
 0x2d1   : > { %3215 = vst [vmem:[%s4859_s16 + $0x150] sm:$0xff] %v3639_v63  ;;  %3216 = vst [vmem:[%s4859_s16 + $0x158] sm:$0xff] %v3640_v40  ;;  %v3708_v19 = vadd.f32 %v2228_v34, %v4842_v33  ;;  %v3772_v55 = vadd.f32 %v2614_v14, %v4846_v42  ;;  %v2230_v60 = vpop.f32.mrb[110].mxu0  ;;  %v2616_v35 = vpop.f32.mrb[110].mxu1 }
 0x2d2   : > { %v2749_v43 = vmax.f32 %v3707_v37, 0.0  ;;  %v2751_v20 = vmax.f32 %v3771_v3, 0.0  ;;  %v3709_v24 = vadd.f32 %v2230_v60, %v4834_v16  ;;  %v3773_v6 = vadd.f32 %v2616_v35, %v4838_v56  ;;  %v2232_v9 = vpop.f32.mrb[111].mxu0  ;;  %v2618_v54 = vpop.f32.mrb[111].mxu1 }
 0x2d3   : > { %v2750_v62 = vmax.f32 %v3708_v19, 0.0  ;;  %v2752_v48 = vmax.f32 %v3772_v55, 0.0  ;;  %v3710_v52 = vadd.f32 %v2232_v9, %v4842_v33  ;;  %v3774_v39 = vadd.f32 %v2618_v54, %v4846_v42 }
 0x2d4   : > { %v2753_v41 = vmax.f32 %v3709_v24, 0.0  ;;  %v2755_v44 = vmax.f32 %v3773_v6, 0.0 }
 0x2d5   : > { %v3641_v46 = vpack.c.bf16 %v2750_v62, %v2749_v43  ;;  %v3642_v47 = vpack.c.bf16 %v2752_v48, %v2751_v20  ;;  %v2754_v49 = vmax.f32 %v3710_v52, 0.0  ;;  %v2756_v51 = vmax.f32 %v3774_v39, 0.0 }
 0x2d7   : > { %3217 = vst [vmem:[%s4859_s16 + $0x160] sm:$0xff] %v3641_v46  ;;  %3218 = vst [vmem:[%s4859_s16 + $0x168] sm:$0xff] %v3642_v47  ;;  %v3643_v0 = vpack.c.bf16 %v2754_v49, %v2753_v41  ;;  %v3644_v53 = vpack.c.bf16 %v2756_v51, %v2755_v44  ;;  %v2236_v57 = vpop.f32.mrb[112].mxu0  ;;  %v2622_v58 = vpop.f32.mrb[112].mxu1 }
 0x2d8   : > { %v3711_v1 = vadd.f32 %v2236_v57, %v4834_v16  ;;  %v3775_v5 = vadd.f32 %v2622_v58, %v4838_v56  ;;  %v2238_v2 = vpop.f32.mrb[113].mxu0  ;;  %v2624_v7 = vpop.f32.mrb[113].mxu1 }
 0x2d9   : > { %3219 = vst [vmem:[%s4859_s16 + $0x170] sm:$0xff] %v3643_v0  ;;  %3220 = vst [vmem:[%s4859_s16 + $0x178] sm:$0xff] %v3644_v53  ;;  %v3712_v8 = vadd.f32 %v2238_v2, %v4842_v33  ;;  %v3776_v10 = vadd.f32 %v2624_v7, %v4846_v42  ;;  %v2240_v11 = vpop.f32.mrb[114].mxu0  ;;  %v2626_v12 = vpop.f32.mrb[114].mxu1 }
 0x2da   : > { %v2757_v17 = vmax.f32 %v3711_v1, 0.0  ;;  %v2759_v18 = vmax.f32 %v3775_v5, 0.0  ;;  %v3713_v22 = vadd.f32 %v2240_v11, %v4834_v16  ;;  %v3777_v23 = vadd.f32 %v2626_v12, %v4838_v56  ;;  %v2242_v61 = vpop.f32.mrb[115].mxu0  ;;  %v2628_v25 = vpop.f32.mrb[115].mxu1 }
 0x2db   : > { %v2758_v26 = vmax.f32 %v3712_v8, 0.0  ;;  %v2760_v27 = vmax.f32 %v3776_v10, 0.0  ;;  %v3714_v29 = vadd.f32 %v2242_v61, %v4842_v33  ;;  %v3778_v30 = vadd.f32 %v2628_v25, %v4846_v42 }
 0x2dc   : > { %v2761_v31 = vmax.f32 %v3713_v22, 0.0  ;;  %v2763_v32 = vmax.f32 %v3777_v23, 0.0 }
 0x2dd   : > { %v3645_v36 = vpack.c.bf16 %v2758_v26, %v2757_v17  ;;  %v3646_v13 = vpack.c.bf16 %v2760_v27, %v2759_v18  ;;  %v2762_v15 = vmax.f32 %v3714_v29, 0.0  ;;  %v2764_v21 = vmax.f32 %v3778_v30, 0.0 }
 0x2df   : > { %3221 = vst [vmem:[%s4859_s16 + $0x180] sm:$0xff] %v3645_v36  ;;  %3222 = vst [vmem:[%s4859_s16 + $0x188] sm:$0xff] %v3646_v13  ;;  %v3647_v59 = vpack.c.bf16 %v2762_v15, %v2761_v31  ;;  %v3648_v38 = vpack.c.bf16 %v2764_v21, %v2763_v32  ;;  %v2246_v4 = vpop.f32.mrb[116].mxu0  ;;  %v2632_v45 = vpop.f32.mrb[116].mxu1 }
 0x2e0   : > { %v3715_v63 = vadd.f32 %v2246_v4, %v4834_v16  ;;  %v3779_v40 = vadd.f32 %v2632_v45, %v4838_v56  ;;  %v2248_v50 = vpop.f32.mrb[117].mxu0  ;;  %v2634_v28 = vpop.f32.mrb[117].mxu1 }
 0x2e1   : > { %3223 = vst [vmem:[%s4859_s16 + $0x190] sm:$0xff] %v3647_v59  ;;  %3224 = vst [vmem:[%s4859_s16 + $0x198] sm:$0xff] %v3648_v38  ;;  %v3716_v37 = vadd.f32 %v2248_v50, %v4842_v33  ;;  %v3780_v3 = vadd.f32 %v2634_v28, %v4846_v42  ;;  %v2250_v34 = vpop.f32.mrb[118].mxu0  ;;  %v2636_v14 = vpop.f32.mrb[118].mxu1 }
 0x2e2   : > { %v2765_v19 = vmax.f32 %v3715_v63, 0.0  ;;  %v2767_v55 = vmax.f32 %v3779_v40, 0.0  ;;  %v3717_v60 = vadd.f32 %v2250_v34, %v4834_v16  ;;  %v3781_v35 = vadd.f32 %v2636_v14, %v4838_v56  ;;  %v2252_v43 = vpop.f32.mrb[119].mxu0  ;;  %v2638_v20 = vpop.f32.mrb[119].mxu1 }
 0x2e3   : > { %v2766_v24 = vmax.f32 %v3716_v37, 0.0  ;;  %v2768_v6 = vmax.f32 %v3780_v3, 0.0  ;;  %v3718_v9 = vadd.f32 %v2252_v43, %v4842_v33  ;;  %v3782_v54 = vadd.f32 %v2638_v20, %v4846_v42 }
 0x2e4   : > { %v2769_v62 = vmax.f32 %v3717_v60, 0.0  ;;  %v2771_v48 = vmax.f32 %v3781_v35, 0.0 }
 0x2e5   : > { %v3649_v52 = vpack.c.bf16 %v2766_v24, %v2765_v19  ;;  %v3650_v39 = vpack.c.bf16 %v2768_v6, %v2767_v55  ;;  %v2770_v41 = vmax.f32 %v3718_v9, 0.0  ;;  %v2772_v44 = vmax.f32 %v3782_v54, 0.0 }
 0x2e7   : > { %3225 = vst [vmem:[%s4859_s16 + $0x1a0] sm:$0xff] %v3649_v52  ;;  %3226 = vst [vmem:[%s4859_s16 + $0x1a8] sm:$0xff] %v3650_v39  ;;  %v3651_v46 = vpack.c.bf16 %v2770_v41, %v2769_v62  ;;  %v3652_v47 = vpack.c.bf16 %v2772_v44, %v2771_v48  ;;  %v2256_v49 = vpop.f32.mrb[120].mxu0  ;;  %v2642_v51 = vpop.f32.mrb[120].mxu1 }
 0x2e8   : > { %v3719_v0 = vadd.f32 %v2256_v49, %v4834_v16  ;;  %v3783_v53 = vadd.f32 %v2642_v51, %v4838_v56  ;;  %v2258_v57 = vpop.f32.mrb[121].mxu0  ;;  %v2644_v58 = vpop.f32.mrb[121].mxu1 }
 0x2e9   : > { %3227 = vst [vmem:[%s4859_s16 + $0x1b0] sm:$0xff] %v3651_v46  ;;  %3228 = vst [vmem:[%s4859_s16 + $0x1b8] sm:$0xff] %v3652_v47  ;;  %v3720_v1 = vadd.f32 %v2258_v57, %v4842_v33  ;;  %v3784_v5 = vadd.f32 %v2644_v58, %v4846_v42  ;;  %v2260_v2 = vpop.f32.mrb[122].mxu0  ;;  %v2646_v7 = vpop.f32.mrb[122].mxu1 }
 0x2ea   : > { %v2773_v8 = vmax.f32 %v3719_v0, 0.0  ;;  %v2775_v10 = vmax.f32 %v3783_v53, 0.0  ;;  %v3721_v11 = vadd.f32 %v2260_v2, %v4834_v16  ;;  %v3785_v12 = vadd.f32 %v2646_v7, %v4838_v56  ;;  %v2262_v17 = vpop.f32.mrb[123].mxu0  ;;  %v2648_v18 = vpop.f32.mrb[123].mxu1 }
 0x2eb   : > { %v2774_v22 = vmax.f32 %v3720_v1, 0.0  ;;  %v2776_v23 = vmax.f32 %v3784_v5, 0.0  ;;  %v3722_v61 = vadd.f32 %v2262_v17, %v4842_v33  ;;  %v3786_v25 = vadd.f32 %v2648_v18, %v4846_v42 }
 0x2ec   : > { %v2777_v26 = vmax.f32 %v3721_v11, 0.0  ;;  %v2779_v27 = vmax.f32 %v3785_v12, 0.0 }
 0x2ed   : > { %v3653_v29 = vpack.c.bf16 %v2774_v22, %v2773_v8  ;;  %v3654_v30 = vpack.c.bf16 %v2776_v23, %v2775_v10  ;;  %v2778_v31 = vmax.f32 %v3722_v61, 0.0  ;;  %v2780_v32 = vmax.f32 %v3786_v25, 0.0 }
 0x2ef   : > { %3229 = vst [vmem:[%s4859_s16 + $0x1c0] sm:$0xff] %v3653_v29  ;;  %3230 = vst [vmem:[%s4859_s16 + $0x1c8] sm:$0xff] %v3654_v30  ;;  %v3655_v36 = vpack.c.bf16 %v2778_v31, %v2777_v26  ;;  %v3656_v13 = vpack.c.bf16 %v2780_v32, %v2779_v27  ;;  %v2266_v15 = vpop.f32.mrb[124].mxu0  ;;  %v2652_v21 = vpop.f32.mrb[124].mxu1 }
 0x2f0   : > { %v3723_v59 = vadd.f32 %v2266_v15, %v4834_v16  ;;  %v3787_v38 = vadd.f32 %v2652_v21, %v4838_v56  ;;  %v2268_v4 = vpop.f32.mrb[125].mxu0  ;;  %v2654_v45 = vpop.f32.mrb[125].mxu1 }
 0x2f1   : > { %3231 = vst [vmem:[%s4859_s16 + $0x1d0] sm:$0xff] %v3655_v36  ;;  %3232 = vst [vmem:[%s4859_s16 + $0x1d8] sm:$0xff] %v3656_v13  ;;  %v3724_v63 = vadd.f32 %v2268_v4, %v4842_v33  ;;  %v3788_v40 = vadd.f32 %v2654_v45, %v4846_v42  ;;  %v2270_v50 = vpop.f32.mrb[126].mxu0  ;;  %v2656_v28 = vpop.f32.mrb[126].mxu1 }
 0x2f2   : > { %v2781_v37 = vmax.f32 %v3723_v59, 0.0  ;;  %v2783_v3 = vmax.f32 %v3787_v38, 0.0  ;;  %v3725_v34 = vadd.f32 %v2270_v50, %v4834_v16  ;;  %v3789_v14 = vadd.f32 %v2656_v28, %v4838_v56  ;;  %v2272_v19 = vpop.f32.mrb[127].mxu0  ;;  %v2658_v55 = vpop.f32.mrb[127].mxu1 }
 0x2f3   : > { %v2782_v60 = vmax.f32 %v3724_v63, 0.0  ;;  %v2784_v35 = vmax.f32 %v3788_v40, 0.0  ;;  %v3726_v43 = vadd.f32 %v2272_v19, %v4842_v33  ;;  %v3790_v20 = vadd.f32 %v2658_v55, %v4846_v42 }
 0x2f4   : > { %v2785_v24 = vmax.f32 %v3725_v34, 0.0  ;;  %v2787_v6 = vmax.f32 %v3789_v14, 0.0 }
 0x2f5   : > { %v3657_v16 = vpack.c.bf16 %v2782_v60, %v2781_v37  ;;  %v3658_v56 = vpack.c.bf16 %v2784_v35, %v2783_v3  ;;  %v2786_v9 = vmax.f32 %v3726_v43, 0.0  ;;  %v2788_v54 = vmax.f32 %v3790_v20, 0.0 }
 0x2f7   : > { %3233 = vst [vmem:[%s4859_s16 + $0x1e0] sm:$0xff] %v3657_v16  ;;  %3234 = vst [vmem:[%s4859_s16 + $0x1e8] sm:$0xff] %v3658_v56  ;;  %v3659_v33 = vpack.c.bf16 %v2786_v9, %v2785_v24  ;;  %v3660_v42 = vpack.c.bf16 %v2788_v54, %v2787_v6 }
 0x2f9   : > { %3235 = vst [vmem:[%s4859_s16 + $0x1f0] sm:$0xff] %v3659_v33  ;;  %3236 = vst [vmem:[%s4859_s16 + $0x1f8] sm:$0xff] %v3660_v42 }
 0x2fa   : > { %4247 = shalt.err (!%p4244_p7)
}
 0x2fb   : > { %s4248_s11 = scalar_lea.hbm %s5046_s8, 8192  ;;  %s4252_s13 = scalar_lea.hbm %s5102_s5, 16384 }
 0x2fc   : > { %p4249_p8 = scmp.ne.s32.totalorder %s5046_s8, %s4248_s11  ;;  %p4253_p1 = scmp.lt.u32.totalorder %s5046_s8, %s5102_s5 }
 0x2fd   : > { %p4254_p0 = scmp.lt.u32.totalorder %s4252_s13, %s4248_s11  ;;  %p4256_p6 = scmp.lt.u32.totalorder %s4248_s11, %s5046_s8 }
 0x2fe   : > { %p4250_p11 = pnand %p4249_p8, %p5113_p9 }
 0x2ff   : > { %p4255_p5 = por %p4254_p0, %p4253_p1 }
 0x300   : > { %p4251_p13 = pneg %p4250_p11 }
 0x301   : > { %p4257_p10 = por %p4256_p6, %p4255_p5 }
 0x303   : > { %p4258_p12 = pnand %p4257_p10, %p4251_p13 }
 0x305   : > { %4261 = shalt.err (!%p4258_p12)
}
 0x306   : > { %s4307_s16 = smov 256   ;;  %s4308_s17 = smov 16  }
 0x307   : > { %3923 = dma.vmem_to_hbm [thread:$0]  (%p5113_p9), %s5048_s23, 8192, %s5046_s8, %s5056_s22, %s4307_s16, %s4307_s16, %s4308_s17  }
 0x308 PF: > { %p3935_p2 = scmp.ge.s32.totalorder %s4300_s21, 2  ;;  %s3267_s26 = sand.u32 1, %s4288_s18  }
 0x309   : > { %p5114_p3 = scmp.ne.s32.totalorder %s5107_s29, 0  ;;  %s3268_s6 = scalar_lea.sflag [#allocation4], %s3267_s26 }
 0x30b   : > { %p3930_p4 = pnand %p3935_p2, %p5114_p3 }
 0x30d   : > { %4283 = dma.done.wait (!%p3930_p4), %s3268_s6, 8192  }
 0x30e   : > { %4285 = vsyncadd (!%p3930_p4), %s3268_s6, 4294959104  ;;  %p16_p7 = scmp.ge.s32.totalorder %s4364_s24, 4   ;;  %s5115_s18 = smov %s4292_s19 }
 0x30f   : > { %s5116_s19 = smov %s4296_s20  ;;  %s5117_s20 = smov %s4375_s27 }
 0x310   : > { %s5118_s21 = smov %s4364_s24  ;;  %18 = sbr.rel (!%p16_p7) target bundleno = 4 (0x4), region = 80 }
 0x317   :  { %3273 = vsyncpa [#allocation3], 1 }
 0x318   :  { %3275 = vsyncpa [#allocation3 + $0x1], 1 }
 0x319   :  { %3276 = vsyncpa [#allocation4], 1 }
 0x31a   :  { %3278 = vsyncpa [#allocation4 + $0x1], 1 }

</bundles_post_ra>
